<compile_context>
chip_gen: v7x
topology: tpu7x:2x2x1
jax: 0.10.0
libtpu: 0.0.40
codegen_flags: <defaults>
</compile_context>

<pallas_src>
import math

import jax
import jax.numpy as jnp
from jax.experimental import pallas as pl
from jax.experimental.pallas import tpu as pltpu

INPUT_CHANNELS = 4
CONV_NUM_FILTERS = 1
CONV_FILTER_WIDTH = 11
CONV_PAD = CONV_FILTER_WIDTH // 2
FC_NUM_UNITS = 5
OUTPUT_UNITS = 2


def _model_kernel(x_ref, wconv_ref, bconv_ref, w1_ref, b1_ref, w2_ref,
                  b2_ref, out_ref, xe_ref):
    """Fused forward pass for one batch tile.

    x_ref    : (C, TB, L)         f32  VMEM  conv input, channel-major
    wconv_ref: (C, K)             f32  SMEM  conv filter (single out channel)
    bconv_ref: (1,)               f32  SMEM
    w1_ref   : (FC,)              f32  SMEM  fc1 weight (fan-in = 1)
    b1_ref   : (FC,)              f32  SMEM
    w2_ref   : (OUT, FC)          f32  SMEM
    b2_ref   : (OUT,)             f32  SMEM
    out_ref  : (TB, OUT)          f32  VMEM
    xe_ref   : (C, TB, L + 2*PAD) f32  VMEM scratch (zero-padded input)
    """
    C, TB, L = x_ref.shape

    # ---- in-kernel halo: zero the pad columns, copy the payload (no HBM pad)
    halo = jnp.zeros((C, TB, CONV_PAD), dtype=jnp.float32)
    xe_ref[:, :, 0:CONV_PAD] = halo
    xe_ref[:, :, CONV_PAD + L:CONV_PAD + L + CONV_PAD] = halo
    xe_ref[:, :, CONV_PAD:CONV_PAD + L] = x_ref[...]

    # ---- Conv1d: C*K scalar-weight FMAs on the VPU, bias folded in ----------
    acc = jnp.zeros((TB, L), dtype=jnp.float32) + bconv_ref[0]
    for c in range(C):
        for k in range(CONV_FILTER_WIDTH):
            acc = acc + xe_ref[c, :, k:k + L] * wconv_ref[c, k]

    # ---- ReLU + global max pool (single cross-lane reduce) ------------------
    pooled = jnp.max(jnp.maximum(acc, 0.0), axis=-1, keepdims=True)   # (TB, 1)

    # ---- fc1: Linear(1 -> FC) + ReLU, scalar FMAs (keep the MXU out) --------
    h = [jnp.maximum(pooled * w1_ref[j] + b1_ref[j], 0.0)
         for j in range(FC_NUM_UNITS)]                                # (TB, 1)

    # ---- fc2: Linear(FC -> OUT), scalar FMAs ---------------------------------
    for o in range(OUTPUT_UNITS):
        col = jnp.zeros((TB, 1), dtype=jnp.float32) + b2_ref[o]
        for j in range(FC_NUM_UNITS):
            col = col + h[j] * w2_ref[o, j]
        out_ref[:, o:o + 1] = col.astype(out_ref.dtype)


def _pick_batch_tile(B):
    # Small batches: a single block (each grid step costs ~0.35us on the
    # single-TC v5e/v6e). Large batches: tile in multiples of 8 so the
    # "parallel" grid axis can feed both v7x TensorCores and double-buffered
    # blocks stay well inside VMEM (v7x has only 64 MiB physical).
    if B <= 256:
        return B
    return 256


def torch_model_forward(x, params):
    """x: (B, C=4, L) float32, PyTorch NCL layout.  Returns (B, 2) float32."""
    B, C, L = x.shape
    assert C == INPUT_CHANNELS
    Lp = L + 2 * CONV_PAD

    # channel-major layout: batch on sublanes, length on lanes.
    x_cm = jnp.transpose(x, (1, 0, 2))                    # (C, B, L)

    wconv = params["conv_w"].reshape(INPUT_CHANNELS, CONV_FILTER_WIDTH)
    bconv = params["conv_b"].reshape(1)
    w1 = params["fc1_w"].reshape(FC_NUM_UNITS)            # (FC, 1) -> (FC,)
    b1 = params["fc1_b"].reshape(FC_NUM_UNITS)
    w2 = params["fc2_w"].reshape(OUTPUT_UNITS, FC_NUM_UNITS)
    b2 = params["fc2_b"].reshape(OUTPUT_UNITS)

    tb = _pick_batch_tile(B)
    grid = (pl.cdiv(B, tb),)

    # VMEM budget: double-buffered in/out blocks + padded scratch + headroom,
    # clamped to stay inside v7x's 64 MiB physical VMEM.
    in_block = INPUT_CHANNELS * tb * L * 4
    out_block = tb * OUTPUT_UNITS * 4
    scratch = INPUT_CHANNELS * tb * Lp * 4
    needed = 2 * in_block + 2 * out_block + scratch + (2 << 20)
    vmem_limit = int(min(max(needed, 32 * 1024 * 1024), 56 * 1024 * 1024))

    smem = pl.BlockSpec(memory_space=pltpu.MemorySpace.SMEM)

    # TODO(synk): for very large B, a lane-dense (OUT, B) output layout would
    # avoid masked 2-wide stores; kept (B, OUT) to match the module contract.
    return pl.pallas_call(
        _model_kernel,
        out_shape=jax.ShapeDtypeStruct((B, OUTPUT_UNITS), jnp.float32),
        grid=grid,
        in_specs=[
            pl.BlockSpec((INPUT_CHANNELS, tb, L), lambda b: (0, b, 0)),
            smem, smem, smem, smem, smem, smem,
        ],
        out_specs=pl.BlockSpec((tb, OUTPUT_UNITS), lambda b: (b, 0)),
        scratch_shapes=[pltpu.VMEM((INPUT_CHANNELS, tb, Lp), jnp.float32)],
        compiler_params=pltpu.CompilerParams(
            dimension_semantics=("parallel",),
            vmem_limit_bytes=vmem_limit),
    )(x_cm, wconv, bconv, w1, b1, w2, b2)


def init_params(key):
    """Deterministic parameter init (PyTorch-style uniform fan-in bounds)."""
    ks = jax.random.split(key, 6)

    def u(k, shape, fan_in):
        bound = 1.0 / math.sqrt(fan_in)
        return jax.random.uniform(k, shape, jnp.float32, -bound, bound)

    conv_fan = INPUT_CHANNELS * CONV_FILTER_WIDTH
    return {
        "conv_w": u(ks[0], (CONV_NUM_FILTERS, INPUT_CHANNELS,
                            CONV_FILTER_WIDTH), conv_fan),
        "conv_b": u(ks[1], (CONV_NUM_FILTERS,), conv_fan),
        "fc1_w": u(ks[2], (FC_NUM_UNITS, CONV_NUM_FILTERS), CONV_NUM_FILTERS),
        "fc1_b": u(ks[3], (FC_NUM_UNITS,), CONV_NUM_FILTERS),
        "fc2_w": u(ks[4], (OUTPUT_UNITS, FC_NUM_UNITS), FC_NUM_UNITS),
        "fc2_b": u(ks[5], (OUTPUT_UNITS,), FC_NUM_UNITS),
    }


def reference_forward(x, params):
    """Plain-JAX reference of the PyTorch forward for correctness check."""
    B, C, L = x.shape
    x_pad = jnp.pad(x, ((0, 0), (0, 0), (CONV_PAD, CONV_PAD)))
    w = params["conv_w"][0]                    # (C, K)
    conv = jnp.zeros((B, L), jnp.float32)
    for k in range(CONV_FILTER_WIDTH):
        conv = conv + jnp.einsum("bcl,c->bl", x_pad[:, :, k:k + L], w[:, k])
    conv = conv + params["conv_b"][0]
    pooled = jnp.max(jax.nn.relu(conv), axis=-1, keepdims=True)  # (B, 1)
    h = jax.nn.relu(pooled @ params["fc1_w"].T + params["fc1_b"])
    return h @ params["fc2_w"].T + params["fc2_b"]


if __name__ == "__main__":
    key = jax.random.PRNGKey(0)
    k_x, k_p = jax.random.split(key)

    B, C, L = 2, INPUT_CHANNELS, 150   # DNA one-hot: 4 channels x length 150
    x = jax.random.normal(k_x, (B, C, L), jnp.float32)
    params = init_params(k_p)

    out = jax.block_until_ready(torch_model_forward(x, params))
    ref = reference_forward(x, params)

    assert out.shape == (B, OUTPUT_UNITS), out.shape
    assert jnp.allclose(out, ref, atol=1e-5, rtol=1e-5), (out, ref)
    print("KERNEL_OK")
</pallas_src>

<mosaic_0001>
module attributes {stable_mosaic.version = 11 : i64} {
  func.func @_model_kernel(%arg0: i32, %arg1: memref<4x2x150xf32, #tpu.memory_space<vmem>>, %arg2: memref<4x11xf32, #tpu.memory_space<smem>>, %arg3: memref<1xf32, #tpu.memory_space<smem>>, %arg4: memref<5xf32, #tpu.memory_space<smem>>, %arg5: memref<5xf32, #tpu.memory_space<smem>>, %arg6: memref<2x5xf32, #tpu.memory_space<smem>>, %arg7: memref<2xf32, #tpu.memory_space<smem>>, %arg8: memref<2x2xf32, #tpu.memory_space<vmem>>, %arg9: memref<4x2x160xf32, #tpu.memory_space<vmem>>) attributes {dimension_semantics = [#tpu.dimension_semantics<parallel>], iteration_bounds = array<i64: 1>, scalar_prefetch = 0 : i64, scratch_operands = 1 : i64, tpu.core_type = #tpu.core_type<tc>, window_params = [{transform_indices = @transform_0, window_bounds = array<i64: 4, 2, 150>}, {transform_indices = @transform_1, window_bounds = array<i64: 4, 11>}, {transform_indices = @transform_2, window_bounds = array<i64: 1>}, {transform_indices = @transform_3, window_bounds = array<i64: 5>}, {transform_indices = @transform_4, window_bounds = array<i64: 5>}, {transform_indices = @transform_5, window_bounds = array<i64: 2, 5>}, {transform_indices = @transform_6, window_bounds = array<i64: 2>}, {transform_indices = @transform_7, window_bounds = array<i64: 2, 2>}]} {
    %cst = arith.constant 0.000000e+00 : f32
    %0 = vector.broadcast %cst : f32 to vector<4x2x5xf32>
    %c0 = arith.constant 0 : index
    %c0_0 = arith.constant 0 : index
    %c0_1 = arith.constant 0 : index
    %1 = vector.load %arg9[%c0, %c0_0, %c0_1] : memref<4x2x160xf32, #tpu.memory_space<vmem>>, vector<4x2x5xf32>
    tpu.vector_store %arg9[%c0, %c0_0, %c0_1], %0 {strides = array<i32>} : memref<4x2x160xf32, #tpu.memory_space<vmem>>, vector<4x2x5xf32>,
    %c0_2 = arith.constant 0 : index
    %c0_3 = arith.constant 0 : index
    %c155 = arith.constant 155 : index
    %2 = vector.load %arg9[%c0_2, %c0_3, %c155] : memref<4x2x160xf32, #tpu.memory_space<vmem>>, vector<4x2x5xf32>
    tpu.vector_store %arg9[%c0_2, %c0_3, %c155], %0 {strides = array<i32>} : memref<4x2x160xf32, #tpu.memory_space<vmem>>, vector<4x2x5xf32>,
    %c0_4 = arith.constant 0 : index
    %c0_5 = arith.constant 0 : index
    %c0_6 = arith.constant 0 : index
    %3 = vector.load %arg1[%c0_4, %c0_5, %c0_6] : memref<4x2x150xf32, #tpu.memory_space<vmem>>, vector<4x2x150xf32>
    %c0_7 = arith.constant 0 : index
    %c0_8 = arith.constant 0 : index
    %c5 = arith.constant 5 : index
    %4 = vector.load %arg9[%c0_7, %c0_8, %c5] : memref<4x2x160xf32, #tpu.memory_space<vmem>>, vector<4x2x150xf32>
    tpu.vector_store %arg9[%c0_7, %c0_8, %c5], %3 {strides = array<i32>} : memref<4x2x160xf32, #tpu.memory_space<vmem>>, vector<4x2x150xf32>,
    %cst_9 = arith.constant 0.000000e+00 : f32
    %5 = vector.broadcast %cst_9 : f32 to vector<2x150xf32>
    %c0_10 = arith.constant 0 : index
    %6 = memref.load %arg3[%c0_10] : memref<1xf32, #tpu.memory_space<smem>>
    %7 = vector.broadcast %6 : f32 to vector<2x150xf32>
    %8 = arith.addf %5, %7 : vector<2x150xf32>
    %c0_11 = arith.constant 0 : index
    %c0_12 = arith.constant 0 : index
    %c0_13 = arith.constant 0 : index
    %9 = vector.load %arg9[%c0_11, %c0_12, %c0_13] : memref<4x2x160xf32, #tpu.memory_space<vmem>>, vector<1x2x150xf32>
    %10 = vector.shape_cast %9 : vector<1x2x150xf32> to vector<2x150xf32>
    %c0_14 = arith.constant 0 : index
    %c0_15 = arith.constant 0 : index
    %11 = memref.load %arg2[%c0_14, %c0_15] : memref<4x11xf32, #tpu.memory_space<smem>>
    %12 = vector.broadcast %11 : f32 to vector<2x150xf32>
    %13 = arith.mulf %10, %12 : vector<2x150xf32>
    %14 = arith.addf %8, %13 : vector<2x150xf32>
    %c0_16 = arith.constant 0 : index
    %c0_17 = arith.constant 0 : index
    %c1 = arith.constant 1 : index
    %15 = vector.load %arg9[%c0_16, %c0_17, %c1] : memref<4x2x160xf32, #tpu.memory_space<vmem>>, vector<1x2x150xf32>
    %16 = vector.shape_cast %15 : vector<1x2x150xf32> to vector<2x150xf32>
    %c0_18 = arith.constant 0 : index
    %c1_19 = arith.constant 1 : index
    %17 = memref.load %arg2[%c0_18, %c1_19] : memref<4x11xf32, #tpu.memory_space<smem>>
    %18 = vector.broadcast %17 : f32 to vector<2x150xf32>
    %19 = arith.mulf %16, %18 : vector<2x150xf32>
    %20 = arith.addf %14, %19 : vector<2x150xf32>
    %c0_20 = arith.constant 0 : index
    %c0_21 = arith.constant 0 : index
    %c2 = arith.constant 2 : index
    %21 = vector.load %arg9[%c0_20, %c0_21, %c2] : memref<4x2x160xf32, #tpu.memory_space<vmem>>, vector<1x2x150xf32>
    %22 = vector.shape_cast %21 : vector<1x2x150xf32> to vector<2x150xf32>
    %c0_22 = arith.constant 0 : index
    %c2_23 = arith.constant 2 : index
    %23 = memref.load %arg2[%c0_22, %c2_23] : memref<4x11xf32, #tpu.memory_space<smem>>
    %24 = vector.broadcast %23 : f32 to vector<2x150xf32>
    %25 = arith.mulf %22, %24 : vector<2x150xf32>
    %26 = arith.addf %20, %25 : vector<2x150xf32>
    %c0_24 = arith.constant 0 : index
    %c0_25 = arith.constant 0 : index
    %c3 = arith.constant 3 : index
    %27 = vector.load %arg9[%c0_24, %c0_25, %c3] : memref<4x2x160xf32, #tpu.memory_space<vmem>>, vector<1x2x150xf32>
    %28 = vector.shape_cast %27 : vector<1x2x150xf32> to vector<2x150xf32>
    %c0_26 = arith.constant 0 : index
    %c3_27 = arith.constant 3 : index
    %29 = memref.load %arg2[%c0_26, %c3_27] : memref<4x11xf32, #tpu.memory_space<smem>>
    %30 = vector.broadcast %29 : f32 to vector<2x150xf32>
    %31 = arith.mulf %28, %30 : vector<2x150xf32>
    %32 = arith.addf %26, %31 : vector<2x150xf32>
    %c0_28 = arith.constant 0 : index
    %c0_29 = arith.constant 0 : index
    %c4 = arith.constant 4 : index
    %33 = vector.load %arg9[%c0_28, %c0_29, %c4] : memref<4x2x160xf32, #tpu.memory_space<vmem>>, vector<1x2x150xf32>
    %34 = vector.shape_cast %33 : vector<1x2x150xf32> to vector<2x150xf32>
    %c0_30 = arith.constant 0 : index
    %c4_31 = arith.constant 4 : index
    %35 = memref.load %arg2[%c0_30, %c4_31] : memref<4x11xf32, #tpu.memory_space<smem>>
    %36 = vector.broadcast %35 : f32 to vector<2x150xf32>
    %37 = arith.mulf %34, %36 : vector<2x150xf32>
    %38 = arith.addf %32, %37 : vector<2x150xf32>
    %c0_32 = arith.constant 0 : index
    %c0_33 = arith.constant 0 : index
    %c5_34 = arith.constant 5 : index
    %39 = vector.load %arg9[%c0_32, %c0_33, %c5_34] : memref<4x2x160xf32, #tpu.memory_space<vmem>>, vector<1x2x150xf32>
    %40 = vector.shape_cast %39 : vector<1x2x150xf32> to vector<2x150xf32>
    %c0_35 = arith.constant 0 : index
    %c5_36 = arith.constant 5 : index
    %41 = memref.load %arg2[%c0_35, %c5_36] : memref<4x11xf32, #tpu.memory_space<smem>>
    %42 = vector.broadcast %41 : f32 to vector<2x150xf32>
    %43 = arith.mulf %40, %42 : vector<2x150xf32>
    %44 = arith.addf %38, %43 : vector<2x150xf32>
    %c0_37 = arith.constant 0 : index
    %c0_38 = arith.constant 0 : index
    %c6 = arith.constant 6 : index
    %45 = vector.load %arg9[%c0_37, %c0_38, %c6] : memref<4x2x160xf32, #tpu.memory_space<vmem>>, vector<1x2x150xf32>
    %46 = vector.shape_cast %45 : vector<1x2x150xf32> to vector<2x150xf32>
    %c0_39 = arith.constant 0 : index
    %c6_40 = arith.constant 6 : index
    %47 = memref.load %arg2[%c0_39, %c6_40] : memref<4x11xf32, #tpu.memory_space<smem>>
    %48 = vector.broadcast %47 : f32 to vector<2x150xf32>
    %49 = arith.mulf %46, %48 : vector<2x150xf32>
    %50 = arith.addf %44, %49 : vector<2x150xf32>
    %c0_41 = arith.constant 0 : index
    %c0_42 = arith.constant 0 : index
    %c7 = arith.constant 7 : index
    %51 = vector.load %arg9[%c0_41, %c0_42, %c7] : memref<4x2x160xf32, #tpu.memory_space<vmem>>, vector<1x2x150xf32>
    %52 = vector.shape_cast %51 : vector<1x2x150xf32> to vector<2x150xf32>
    %c0_43 = arith.constant 0 : index
    %c7_44 = arith.constant 7 : index
    %53 = memref.load %arg2[%c0_43, %c7_44] : memref<4x11xf32, #tpu.memory_space<smem>>
    %54 = vector.broadcast %53 : f32 to vector<2x150xf32>
    %55 = arith.mulf %52, %54 : vector<2x150xf32>
    %56 = arith.addf %50, %55 : vector<2x150xf32>
    %c0_45 = arith.constant 0 : index
    %c0_46 = arith.constant 0 : index
    %c8 = arith.constant 8 : index
    %57 = vector.load %arg9[%c0_45, %c0_46, %c8] : memref<4x2x160xf32, #tpu.memory_space<vmem>>, vector<1x2x150xf32>
    %58 = vector.shape_cast %57 : vector<1x2x150xf32> to vector<2x150xf32>
    %c0_47 = arith.constant 0 : index
    %c8_48 = arith.constant 8 : index
    %59 = memref.load %arg2[%c0_47, %c8_48] : memref<4x11xf32, #tpu.memory_space<smem>>
    %60 = vector.broadcast %59 : f32 to vector<2x150xf32>
    %61 = arith.mulf %58, %60 : vector<2x150xf32>
    %62 = arith.addf %56, %61 : vector<2x150xf32>
    %c0_49 = arith.constant 0 : index
    %c0_50 = arith.constant 0 : index
    %c9 = arith.constant 9 : index
    %63 = vector.load %arg9[%c0_49, %c0_50, %c9] : memref<4x2x160xf32, #tpu.memory_space<vmem>>, vector<1x2x150xf32>
    %64 = vector.shape_cast %63 : vector<1x2x150xf32> to vector<2x150xf32>
    %c0_51 = arith.constant 0 : index
    %c9_52 = arith.constant 9 : index
    %65 = memref.load %arg2[%c0_51, %c9_52] : memref<4x11xf32, #tpu.memory_space<smem>>
    %66 = vector.broadcast %65 : f32 to vector<2x150xf32>
    %67 = arith.mulf %64, %66 : vector<2x150xf32>
    %68 = arith.addf %62, %67 : vector<2x150xf32>
    %c0_53 = arith.constant 0 : index
    %c0_54 = arith.constant 0 : index
    %c10 = arith.constant 10 : index
    %69 = vector.load %arg9[%c0_53, %c0_54, %c10] : memref<4x2x160xf32, #tpu.memory_space<vmem>>, vector<1x2x150xf32>
    %70 = vector.shape_cast %69 : vector<1x2x150xf32> to vector<2x150xf32>
    %c0_55 = arith.constant 0 : index
    %c10_56 = arith.constant 10 : index
    %71 = memref.load %arg2[%c0_55, %c10_56] : memref<4x11xf32, #tpu.memory_space<smem>>
    %72 = vector.broadcast %71 : f32 to vector<2x150xf32>
    %73 = arith.mulf %70, %72 : vector<2x150xf32>
    %74 = arith.addf %68, %73 : vector<2x150xf32>
    %c1_57 = arith.constant 1 : index
    %c0_58 = arith.constant 0 : index
    %c0_59 = arith.constant 0 : index
    %75 = vector.load %arg9[%c1_57, %c0_58, %c0_59] : memref<4x2x160xf32, #tpu.memory_space<vmem>>, vector<1x2x150xf32>
    %76 = vector.shape_cast %75 : vector<1x2x150xf32> to vector<2x150xf32>
    %c1_60 = arith.constant 1 : index
    %c0_61 = arith.constant 0 : index
    %77 = memref.load %arg2[%c1_60, %c0_61] : memref<4x11xf32, #tpu.memory_space<smem>>
    %78 = vector.broadcast %77 : f32 to vector<2x150xf32>
    %79 = arith.mulf %76, %78 : vector<2x150xf32>
    %80 = arith.addf %74, %79 : vector<2x150xf32>
    %c1_62 = arith.constant 1 : index
    %c0_63 = arith.constant 0 : index
    %c1_64 = arith.constant 1 : index
    %81 = vector.load %arg9[%c1_62, %c0_63, %c1_64] : memref<4x2x160xf32, #tpu.memory_space<vmem>>, vector<1x2x150xf32>
    %82 = vector.shape_cast %81 : vector<1x2x150xf32> to vector<2x150xf32>
    %c1_65 = arith.constant 1 : index
    %c1_66 = arith.constant 1 : index
    %83 = memref.load %arg2[%c1_65, %c1_66] : memref<4x11xf32, #tpu.memory_space<smem>>
    %84 = vector.broadcast %83 : f32 to vector<2x150xf32>
    %85 = arith.mulf %82, %84 : vector<2x150xf32>
    %86 = arith.addf %80, %85 : vector<2x150xf32>
    %c1_67 = arith.constant 1 : index
    %c0_68 = arith.constant 0 : index
    %c2_69 = arith.constant 2 : index
    %87 = vector.load %arg9[%c1_67, %c0_68, %c2_69] : memref<4x2x160xf32, #tpu.memory_space<vmem>>, vector<1x2x150xf32>
    %88 = vector.shape_cast %87 : vector<1x2x150xf32> to vector<2x150xf32>
    %c1_70 = arith.constant 1 : index
    %c2_71 = arith.constant 2 : index
    %89 = memref.load %arg2[%c1_70, %c2_71] : memref<4x11xf32, #tpu.memory_space<smem>>
    %90 = vector.broadcast %89 : f32 to vector<2x150xf32>
    %91 = arith.mulf %88, %90 : vector<2x150xf32>
    %92 = arith.addf %86, %91 : vector<2x150xf32>
    %c1_72 = arith.constant 1 : index
    %c0_73 = arith.constant 0 : index
    %c3_74 = arith.constant 3 : index
    %93 = vector.load %arg9[%c1_72, %c0_73, %c3_74] : memref<4x2x160xf32, #tpu.memory_space<vmem>>, vector<1x2x150xf32>
    %94 = vector.shape_cast %93 : vector<1x2x150xf32> to vector<2x150xf32>
    %c1_75 = arith.constant 1 : index
    %c3_76 = arith.constant 3 : index
    %95 = memref.load %arg2[%c1_75, %c3_76] : memref<4x11xf32, #tpu.memory_space<smem>>
    %96 = vector.broadcast %95 : f32 to vector<2x150xf32>
    %97 = arith.mulf %94, %96 : vector<2x150xf32>
    %98 = arith.addf %92, %97 : vector<2x150xf32>
    %c1_77 = arith.constant 1 : index
    %c0_78 = arith.constant 0 : index
    %c4_79 = arith.constant 4 : index
    %99 = vector.load %arg9[%c1_77, %c0_78, %c4_79] : memref<4x2x160xf32, #tpu.memory_space<vmem>>, vector<1x2x150xf32>
    %100 = vector.shape_cast %99 : vector<1x2x150xf32> to vector<2x150xf32>
    %c1_80 = arith.constant 1 : index
    %c4_81 = arith.constant 4 : index
    %101 = memref.load %arg2[%c1_80, %c4_81] : memref<4x11xf32, #tpu.memory_space<smem>>
    %102 = vector.broadcast %101 : f32 to vector<2x150xf32>
    %103 = arith.mulf %100, %102 : vector<2x150xf32>
    %104 = arith.addf %98, %103 : vector<2x150xf32>
    %c1_82 = arith.constant 1 : index
    %c0_83 = arith.constant 0 : index
    %c5_84 = arith.constant 5 : index
    %105 = vector.load %arg9[%c1_82, %c0_83, %c5_84] : memref<4x2x160xf32, #tpu.memory_space<vmem>>, vector<1x2x150xf32>
    %106 = vector.shape_cast %105 : vector<1x2x150xf32> to vector<2x150xf32>
    %c1_85 = arith.constant 1 : index
    %c5_86 = arith.constant 5 : index
    %107 = memref.load %arg2[%c1_85, %c5_86] : memref<4x11xf32, #tpu.memory_space<smem>>
    %108 = vector.broadcast %107 : f32 to vector<2x150xf32>
    %109 = arith.mulf %106, %108 : vector<2x150xf32>
    %110 = arith.addf %104, %109 : vector<2x150xf32>
    %c1_87 = arith.constant 1 : index
    %c0_88 = arith.constant 0 : index
    %c6_89 = arith.constant 6 : index
    %111 = vector.load %arg9[%c1_87, %c0_88, %c6_89] : memref<4x2x160xf32, #tpu.memory_space<vmem>>, vector<1x2x150xf32>
    %112 = vector.shape_cast %111 : vector<1x2x150xf32> to vector<2x150xf32>
    %c1_90 = arith.constant 1 : index
    %c6_91 = arith.constant 6 : index
    %113 = memref.load %arg2[%c1_90, %c6_91] : memref<4x11xf32, #tpu.memory_space<smem>>
    %114 = vector.broadcast %113 : f32 to vector<2x150xf32>
    %115 = arith.mulf %112, %114 : vector<2x150xf32>
    %116 = arith.addf %110, %115 : vector<2x150xf32>
    %c1_92 = arith.constant 1 : index
    %c0_93 = arith.constant 0 : index
    %c7_94 = arith.constant 7 : index
    %117 = vector.load %arg9[%c1_92, %c0_93, %c7_94] : memref<4x2x160xf32, #tpu.memory_space<vmem>>, vector<1x2x150xf32>
    %118 = vector.shape_cast %117 : vector<1x2x150xf32> to vector<2x150xf32>
    %c1_95 = arith.constant 1 : index
    %c7_96 = arith.constant 7 : index
    %119 = memref.load %arg2[%c1_95, %c7_96] : memref<4x11xf32, #tpu.memory_space<smem>>
    %120 = vector.broadcast %119 : f32 to vector<2x150xf32>
    %121 = arith.mulf %118, %120 : vector<2x150xf32>
    %122 = arith.addf %116, %121 : vector<2x150xf32>
    %c1_97 = arith.constant 1 : index
    %c0_98 = arith.constant 0 : index
    %c8_99 = arith.constant 8 : index
    %123 = vector.load %arg9[%c1_97, %c0_98, %c8_99] : memref<4x2x160xf32, #tpu.memory_space<vmem>>, vector<1x2x150xf32>
    %124 = vector.shape_cast %123 : vector<1x2x150xf32> to vector<2x150xf32>
    %c1_100 = arith.constant 1 : index
    %c8_101 = arith.constant 8 : index
    %125 = memref.load %arg2[%c1_100, %c8_101] : memref<4x11xf32, #tpu.memory_space<smem>>
    %126 = vector.broadcast %125 : f32 to vector<2x150xf32>
    %127 = arith.mulf %124, %126 : vector<2x150xf32>
    %128 = arith.addf %122, %127 : vector<2x150xf32>
    %c1_102 = arith.constant 1 : index
    %c0_103 = arith.constant 0 : index
    %c9_104 = arith.constant 9 : index
    %129 = vector.load %arg9[%c1_102, %c0_103, %c9_104] : memref<4x2x160xf32, #tpu.memory_space<vmem>>, vector<1x2x150xf32>
    %130 = vector.shape_cast %129 : vector<1x2x150xf32> to vector<2x150xf32>
    %c1_105 = arith.constant 1 : index
    %c9_106 = arith.constant 9 : index
    %131 = memref.load %arg2[%c1_105, %c9_106] : memref<4x11xf32, #tpu.memory_space<smem>>
    %132 = vector.broadcast %131 : f32 to vector<2x150xf32>
    %133 = arith.mulf %130, %132 : vector<2x150xf32>
    %134 = arith.addf %128, %133 : vector<2x150xf32>
    %c1_107 = arith.constant 1 : index
    %c0_108 = arith.constant 0 : index
    %c10_109 = arith.constant 10 : index
    %135 = vector.load %arg9[%c1_107, %c0_108, %c10_109] : memref<4x2x160xf32, #tpu.memory_space<vmem>>, vector<1x2x150xf32>
    %136 = vector.shape_cast %135 : vector<1x2x150xf32> to vector<2x150xf32>
    %c1_110 = arith.constant 1 : index
    %c10_111 = arith.constant 10 : index
    %137 = memref.load %arg2[%c1_110, %c10_111] : memref<4x11xf32, #tpu.memory_space<smem>>
    %138 = vector.broadcast %137 : f32 to vector<2x150xf32>
    %139 = arith.mulf %136, %138 : vector<2x150xf32>
    %140 = arith.addf %134, %139 : vector<2x150xf32>
    %c2_112 = arith.constant 2 : index
    %c0_113 = arith.constant 0 : index
    %c0_114 = arith.constant 0 : index
    %141 = vector.load %arg9[%c2_112, %c0_113, %c0_114] : memref<4x2x160xf32, #tpu.memory_space<vmem>>, vector<1x2x150xf32>
    %142 = vector.shape_cast %141 : vector<1x2x150xf32> to vector<2x150xf32>
    %c2_115 = arith.constant 2 : index
    %c0_116 = arith.constant 0 : index
    %143 = memref.load %arg2[%c2_115, %c0_116] : memref<4x11xf32, #tpu.memory_space<smem>>
    %144 = vector.broadcast %143 : f32 to vector<2x150xf32>
    %145 = arith.mulf %142, %144 : vector<2x150xf32>
    %146 = arith.addf %140, %145 : vector<2x150xf32>
    %c2_117 = arith.constant 2 : index
    %c0_118 = arith.constant 0 : index
    %c1_119 = arith.constant 1 : index
    %147 = vector.load %arg9[%c2_117, %c0_118, %c1_119] : memref<4x2x160xf32, #tpu.memory_space<vmem>>, vector<1x2x150xf32>
    %148 = vector.shape_cast %147 : vector<1x2x150xf32> to vector<2x150xf32>
    %c2_120 = arith.constant 2 : index
    %c1_121 = arith.constant 1 : index
    %149 = memref.load %arg2[%c2_120, %c1_121] : memref<4x11xf32, #tpu.memory_space<smem>>
    %150 = vector.broadcast %149 : f32 to vector<2x150xf32>
    %151 = arith.mulf %148, %150 : vector<2x150xf32>
    %152 = arith.addf %146, %151 : vector<2x150xf32>
    %c2_122 = arith.constant 2 : index
    %c0_123 = arith.constant 0 : index
    %c2_124 = arith.constant 2 : index
    %153 = vector.load %arg9[%c2_122, %c0_123, %c2_124] : memref<4x2x160xf32, #tpu.memory_space<vmem>>, vector<1x2x150xf32>
    %154 = vector.shape_cast %153 : vector<1x2x150xf32> to vector<2x150xf32>
    %c2_125 = arith.constant 2 : index
    %c2_126 = arith.constant 2 : index
    %155 = memref.load %arg2[%c2_125, %c2_126] : memref<4x11xf32, #tpu.memory_space<smem>>
    %156 = vector.broadcast %155 : f32 to vector<2x150xf32>
    %157 = arith.mulf %154, %156 : vector<2x150xf32>
    %158 = arith.addf %152, %157 : vector<2x150xf32>
    %c2_127 = arith.constant 2 : index
    %c0_128 = arith.constant 0 : index
    %c3_129 = arith.constant 3 : index
    %159 = vector.load %arg9[%c2_127, %c0_128, %c3_129] : memref<4x2x160xf32, #tpu.memory_space<vmem>>, vector<1x2x150xf32>
    %160 = vector.shape_cast %159 : vector<1x2x150xf32> to vector<2x150xf32>
    %c2_130 = arith.constant 2 : index
    %c3_131 = arith.constant 3 : index
    %161 = memref.load %arg2[%c2_130, %c3_131] : memref<4x11xf32, #tpu.memory_space<smem>>
    %162 = vector.broadcast %161 : f32 to vector<2x150xf32>
    %163 = arith.mulf %160, %162 : vector<2x150xf32>
    %164 = arith.addf %158, %163 : vector<2x150xf32>
    %c2_132 = arith.constant 2 : index
    %c0_133 = arith.constant 0 : index
    %c4_134 = arith.constant 4 : index
    %165 = vector.load %arg9[%c2_132, %c0_133, %c4_134] : memref<4x2x160xf32, #tpu.memory_space<vmem>>, vector<1x2x150xf32>
    %166 = vector.shape_cast %165 : vector<1x2x150xf32> to vector<2x150xf32>
    %c2_135 = arith.constant 2 : index
    %c4_136 = arith.constant 4 : index
    %167 = memref.load %arg2[%c2_135, %c4_136] : memref<4x11xf32, #tpu.memory_space<smem>>
    %168 = vector.broadcast %167 : f32 to vector<2x150xf32>
    %169 = arith.mulf %166, %168 : vector<2x150xf32>
    %170 = arith.addf %164, %169 : vector<2x150xf32>
    %c2_137 = arith.constant 2 : index
    %c0_138 = arith.constant 0 : index
    %c5_139 = arith.constant 5 : index
    %171 = vector.load %arg9[%c2_137, %c0_138, %c5_139] : memref<4x2x160xf32, #tpu.memory_space<vmem>>, vector<1x2x150xf32>
    %172 = vector.shape_cast %171 : vector<1x2x150xf32> to vector<2x150xf32>
    %c2_140 = arith.constant 2 : index
    %c5_141 = arith.constant 5 : index
    %173 = memref.load %arg2[%c2_140, %c5_141] : memref<4x11xf32, #tpu.memory_space<smem>>
    %174 = vector.broadcast %173 : f32 to vector<2x150xf32>
    %175 = arith.mulf %172, %174 : vector<2x150xf32>
    %176 = arith.addf %170, %175 : vector<2x150xf32>
    %c2_142 = arith.constant 2 : index
    %c0_143 = arith.constant 0 : index
    %c6_144 = arith.constant 6 : index
    %177 = vector.load %arg9[%c2_142, %c0_143, %c6_144] : memref<4x2x160xf32, #tpu.memory_space<vmem>>, vector<1x2x150xf32>
    %178 = vector.shape_cast %177 : vector<1x2x150xf32> to vector<2x150xf32>
    %c2_145 = arith.constant 2 : index
    %c6_146 = arith.constant 6 : index
    %179 = memref.load %arg2[%c2_145, %c6_146] : memref<4x11xf32, #tpu.memory_space<smem>>
    %180 = vector.broadcast %179 : f32 to vector<2x150xf32>
    %181 = arith.mulf %178, %180 : vector<2x150xf32>
    %182 = arith.addf %176, %181 : vector<2x150xf32>
    %c2_147 = arith.constant 2 : index
    %c0_148 = arith.constant 0 : index
    %c7_149 = arith.constant 7 : index
    %183 = vector.load %arg9[%c2_147, %c0_148, %c7_149] : memref<4x2x160xf32, #tpu.memory_space<vmem>>, vector<1x2x150xf32>
    %184 = vector.shape_cast %183 : vector<1x2x150xf32> to vector<2x150xf32>
    %c2_150 = arith.constant 2 : index
    %c7_151 = arith.constant 7 : index
    %185 = memref.load %arg2[%c2_150, %c7_151] : memref<4x11xf32, #tpu.memory_space<smem>>
    %186 = vector.broadcast %185 : f32 to vector<2x150xf32>
    %187 = arith.mulf %184, %186 : vector<2x150xf32>
    %188 = arith.addf %182, %187 : vector<2x150xf32>
    %c2_152 = arith.constant 2 : index
    %c0_153 = arith.constant 0 : index
    %c8_154 = arith.constant 8 : index
    %189 = vector.load %arg9[%c2_152, %c0_153, %c8_154] : memref<4x2x160xf32, #tpu.memory_space<vmem>>, vector<1x2x150xf32>
    %190 = vector.shape_cast %189 : vector<1x2x150xf32> to vector<2x150xf32>
    %c2_155 = arith.constant 2 : index
    %c8_156 = arith.constant 8 : index
    %191 = memref.load %arg2[%c2_155, %c8_156] : memref<4x11xf32, #tpu.memory_space<smem>>
    %192 = vector.broadcast %191 : f32 to vector<2x150xf32>
    %193 = arith.mulf %190, %192 : vector<2x150xf32>
    %194 = arith.addf %188, %193 : vector<2x150xf32>
    %c2_157 = arith.constant 2 : index
    %c0_158 = arith.constant 0 : index
    %c9_159 = arith.constant 9 : index
    %195 = vector.load %arg9[%c2_157, %c0_158, %c9_159] : memref<4x2x160xf32, #tpu.memory_space<vmem>>, vector<1x2x150xf32>
    %196 = vector.shape_cast %195 : vector<1x2x150xf32> to vector<2x150xf32>
    %c2_160 = arith.constant 2 : index
    %c9_161 = arith.constant 9 : index
    %197 = memref.load %arg2[%c2_160, %c9_161] : memref<4x11xf32, #tpu.memory_space<smem>>
    %198 = vector.broadcast %197 : f32 to vector<2x150xf32>
    %199 = arith.mulf %196, %198 : vector<2x150xf32>
    %200 = arith.addf %194, %199 : vector<2x150xf32>
    %c2_162 = arith.constant 2 : index
    %c0_163 = arith.constant 0 : index
    %c10_164 = arith.constant 10 : index
    %201 = vector.load %arg9[%c2_162, %c0_163, %c10_164] : memref<4x2x160xf32, #tpu.memory_space<vmem>>, vector<1x2x150xf32>
    %202 = vector.shape_cast %201 : vector<1x2x150xf32> to vector<2x150xf32>
    %c2_165 = arith.constant 2 : index
    %c10_166 = arith.constant 10 : index
    %203 = memref.load %arg2[%c2_165, %c10_166] : memref<4x11xf32, #tpu.memory_space<smem>>
    %204 = vector.broadcast %203 : f32 to vector<2x150xf32>
    %205 = arith.mulf %202, %204 : vector<2x150xf32>
    %206 = arith.addf %200, %205 : vector<2x150xf32>
    %c3_167 = arith.constant 3 : index
    %c0_168 = arith.constant 0 : index
    %c0_169 = arith.constant 0 : index
    %207 = vector.load %arg9[%c3_167, %c0_168, %c0_169] : memref<4x2x160xf32, #tpu.memory_space<vmem>>, vector<1x2x150xf32>
    %208 = vector.shape_cast %207 : vector<1x2x150xf32> to vector<2x150xf32>
    %c3_170 = arith.constant 3 : index
    %c0_171 = arith.constant 0 : index
    %209 = memref.load %arg2[%c3_170, %c0_171] : memref<4x11xf32, #tpu.memory_space<smem>>
    %210 = vector.broadcast %209 : f32 to vector<2x150xf32>
    %211 = arith.mulf %208, %210 : vector<2x150xf32>
    %212 = arith.addf %206, %211 : vector<2x150xf32>
    %c3_172 = arith.constant 3 : index
    %c0_173 = arith.constant 0 : index
    %c1_174 = arith.constant 1 : index
    %213 = vector.load %arg9[%c3_172, %c0_173, %c1_174] : memref<4x2x160xf32, #tpu.memory_space<vmem>>, vector<1x2x150xf32>
    %214 = vector.shape_cast %213 : vector<1x2x150xf32> to vector<2x150xf32>
    %c3_175 = arith.constant 3 : index
    %c1_176 = arith.constant 1 : index
    %215 = memref.load %arg2[%c3_175, %c1_176] : memref<4x11xf32, #tpu.memory_space<smem>>
    %216 = vector.broadcast %215 : f32 to vector<2x150xf32>
    %217 = arith.mulf %214, %216 : vector<2x150xf32>
    %218 = arith.addf %212, %217 : vector<2x150xf32>
    %c3_177 = arith.constant 3 : index
    %c0_178 = arith.constant 0 : index
    %c2_179 = arith.constant 2 : index
    %219 = vector.load %arg9[%c3_177, %c0_178, %c2_179] : memref<4x2x160xf32, #tpu.memory_space<vmem>>, vector<1x2x150xf32>
    %220 = vector.shape_cast %219 : vector<1x2x150xf32> to vector<2x150xf32>
    %c3_180 = arith.constant 3 : index
    %c2_181 = arith.constant 2 : index
    %221 = memref.load %arg2[%c3_180, %c2_181] : memref<4x11xf32, #tpu.memory_space<smem>>
    %222 = vector.broadcast %221 : f32 to vector<2x150xf32>
    %223 = arith.mulf %220, %222 : vector<2x150xf32>
    %224 = arith.addf %218, %223 : vector<2x150xf32>
    %c3_182 = arith.constant 3 : index
    %c0_183 = arith.constant 0 : index
    %c3_184 = arith.constant 3 : index
    %225 = vector.load %arg9[%c3_182, %c0_183, %c3_184] : memref<4x2x160xf32, #tpu.memory_space<vmem>>, vector<1x2x150xf32>
    %226 = vector.shape_cast %225 : vector<1x2x150xf32> to vector<2x150xf32>
    %c3_185 = arith.constant 3 : index
    %c3_186 = arith.constant 3 : index
    %227 = memref.load %arg2[%c3_185, %c3_186] : memref<4x11xf32, #tpu.memory_space<smem>>
    %228 = vector.broadcast %227 : f32 to vector<2x150xf32>
    %229 = arith.mulf %226, %228 : vector<2x150xf32>
    %230 = arith.addf %224, %229 : vector<2x150xf32>
    %c3_187 = arith.constant 3 : index
    %c0_188 = arith.constant 0 : index
    %c4_189 = arith.constant 4 : index
    %231 = vector.load %arg9[%c3_187, %c0_188, %c4_189] : memref<4x2x160xf32, #tpu.memory_space<vmem>>, vector<1x2x150xf32>
    %232 = vector.shape_cast %231 : vector<1x2x150xf32> to vector<2x150xf32>
    %c3_190 = arith.constant 3 : index
    %c4_191 = arith.constant 4 : index
    %233 = memref.load %arg2[%c3_190, %c4_191] : memref<4x11xf32, #tpu.memory_space<smem>>
    %234 = vector.broadcast %233 : f32 to vector<2x150xf32>
    %235 = arith.mulf %232, %234 : vector<2x150xf32>
    %236 = arith.addf %230, %235 : vector<2x150xf32>
    %c3_192 = arith.constant 3 : index
    %c0_193 = arith.constant 0 : index
    %c5_194 = arith.constant 5 : index
    %237 = vector.load %arg9[%c3_192, %c0_193, %c5_194] : memref<4x2x160xf32, #tpu.memory_space<vmem>>, vector<1x2x150xf32>
    %238 = vector.shape_cast %237 : vector<1x2x150xf32> to vector<2x150xf32>
    %c3_195 = arith.constant 3 : index
    %c5_196 = arith.constant 5 : index
    %239 = memref.load %arg2[%c3_195, %c5_196] : memref<4x11xf32, #tpu.memory_space<smem>>
    %240 = vector.broadcast %239 : f32 to vector<2x150xf32>
    %241 = arith.mulf %238, %240 : vector<2x150xf32>
    %242 = arith.addf %236, %241 : vector<2x150xf32>
    %c3_197 = arith.constant 3 : index
    %c0_198 = arith.constant 0 : index
    %c6_199 = arith.constant 6 : index
    %243 = vector.load %arg9[%c3_197, %c0_198, %c6_199] : memref<4x2x160xf32, #tpu.memory_space<vmem>>, vector<1x2x150xf32>
    %244 = vector.shape_cast %243 : vector<1x2x150xf32> to vector<2x150xf32>
    %c3_200 = arith.constant 3 : index
    %c6_201 = arith.constant 6 : index
    %245 = memref.load %arg2[%c3_200, %c6_201] : memref<4x11xf32, #tpu.memory_space<smem>>
    %246 = vector.broadcast %245 : f32 to vector<2x150xf32>
    %247 = arith.mulf %244, %246 : vector<2x150xf32>
    %248 = arith.addf %242, %247 : vector<2x150xf32>
    %c3_202 = arith.constant 3 : index
    %c0_203 = arith.constant 0 : index
    %c7_204 = arith.constant 7 : index
    %249 = vector.load %arg9[%c3_202, %c0_203, %c7_204] : memref<4x2x160xf32, #tpu.memory_space<vmem>>, vector<1x2x150xf32>
    %250 = vector.shape_cast %249 : vector<1x2x150xf32> to vector<2x150xf32>
    %c3_205 = arith.constant 3 : index
    %c7_206 = arith.constant 7 : index
    %251 = memref.load %arg2[%c3_205, %c7_206] : memref<4x11xf32, #tpu.memory_space<smem>>
    %252 = vector.broadcast %251 : f32 to vector<2x150xf32>
    %253 = arith.mulf %250, %252 : vector<2x150xf32>
    %254 = arith.addf %248, %253 : vector<2x150xf32>
    %c3_207 = arith.constant 3 : index
    %c0_208 = arith.constant 0 : index
    %c8_209 = arith.constant 8 : index
    %255 = vector.load %arg9[%c3_207, %c0_208, %c8_209] : memref<4x2x160xf32, #tpu.memory_space<vmem>>, vector<1x2x150xf32>
    %256 = vector.shape_cast %255 : vector<1x2x150xf32> to vector<2x150xf32>
    %c3_210 = arith.constant 3 : index
    %c8_211 = arith.constant 8 : index
    %257 = memref.load %arg2[%c3_210, %c8_211] : memref<4x11xf32, #tpu.memory_space<smem>>
    %258 = vector.broadcast %257 : f32 to vector<2x150xf32>
    %259 = arith.mulf %256, %258 : vector<2x150xf32>
    %260 = arith.addf %254, %259 : vector<2x150xf32>
    %c3_212 = arith.constant 3 : index
    %c0_213 = arith.constant 0 : index
    %c9_214 = arith.constant 9 : index
    %261 = vector.load %arg9[%c3_212, %c0_213, %c9_214] : memref<4x2x160xf32, #tpu.memory_space<vmem>>, vector<1x2x150xf32>
    %262 = vector.shape_cast %261 : vector<1x2x150xf32> to vector<2x150xf32>
    %c3_215 = arith.constant 3 : index
    %c9_216 = arith.constant 9 : index
    %263 = memref.load %arg2[%c3_215, %c9_216] : memref<4x11xf32, #tpu.memory_space<smem>>
    %264 = vector.broadcast %263 : f32 to vector<2x150xf32>
    %265 = arith.mulf %262, %264 : vector<2x150xf32>
    %266 = arith.addf %260, %265 : vector<2x150xf32>
    %c3_217 = arith.constant 3 : index
    %c0_218 = arith.constant 0 : index
    %c10_219 = arith.constant 10 : index
    %267 = vector.load %arg9[%c3_217, %c0_218, %c10_219] : memref<4x2x160xf32, #tpu.memory_space<vmem>>, vector<1x2x150xf32>
    %268 = vector.shape_cast %267 : vector<1x2x150xf32> to vector<2x150xf32>
    %c3_220 = arith.constant 3 : index
    %c10_221 = arith.constant 10 : index
    %269 = memref.load %arg2[%c3_220, %c10_221] : memref<4x11xf32, #tpu.memory_space<smem>>
    %270 = vector.broadcast %269 : f32 to vector<2x150xf32>
    %271 = arith.mulf %268, %270 : vector<2x150xf32>
    %272 = arith.addf %266, %271 : vector<2x150xf32>
    %cst_222 = arith.constant 0.000000e+00 : f32
    %273 = vector.broadcast %cst_222 : f32 to vector<2x150xf32>
    %274 = arith.maximumf %272, %273 : vector<2x150xf32>
    %cst_223 = arith.constant dense<0xFF800000> : vector<2xf32>
    %275 = vector.multi_reduction <maximumf>, %274, %cst_223 [1] : vector<2x150xf32> to vector<2xf32>
    %276 = vector.shape_cast %275 : vector<2xf32> to vector<2x1xf32>
    %c0_224 = arith.constant 0 : index
    %277 = memref.load %arg4[%c0_224] : memref<5xf32, #tpu.memory_space<smem>>
    %278 = vector.broadcast %277 : f32 to vector<2x1xf32>
    %279 = arith.mulf %276, %278 : vector<2x1xf32>
    %c0_225 = arith.constant 0 : index
    %280 = memref.load %arg5[%c0_225] : memref<5xf32, #tpu.memory_space<smem>>
    %281 = vector.broadcast %280 : f32 to vector<2x1xf32>
    %282 = arith.addf %279, %281 : vector<2x1xf32>
    %cst_226 = arith.constant 0.000000e+00 : f32
    %283 = vector.broadcast %cst_226 : f32 to vector<2x1xf32>
    %284 = arith.maximumf %282, %283 : vector<2x1xf32>
    %c1_227 = arith.constant 1 : index
    %285 = memref.load %arg4[%c1_227] : memref<5xf32, #tpu.memory_space<smem>>
    %286 = vector.broadcast %285 : f32 to vector<2x1xf32>
    %287 = arith.mulf %276, %286 : vector<2x1xf32>
    %c1_228 = arith.constant 1 : index
    %288 = memref.load %arg5[%c1_228] : memref<5xf32, #tpu.memory_space<smem>>
    %289 = vector.broadcast %288 : f32 to vector<2x1xf32>
    %290 = arith.addf %287, %289 : vector<2x1xf32>
    %cst_229 = arith.constant 0.000000e+00 : f32
    %291 = vector.broadcast %cst_229 : f32 to vector<2x1xf32>
    %292 = arith.maximumf %290, %291 : vector<2x1xf32>
    %c2_230 = arith.constant 2 : index
    %293 = memref.load %arg4[%c2_230] : memref<5xf32, #tpu.memory_space<smem>>
    %294 = vector.broadcast %293 : f32 to vector<2x1xf32>
    %295 = arith.mulf %276, %294 : vector<2x1xf32>
    %c2_231 = arith.constant 2 : index
    %296 = memref.load %arg5[%c2_231] : memref<5xf32, #tpu.memory_space<smem>>
    %297 = vector.broadcast %296 : f32 to vector<2x1xf32>
    %298 = arith.addf %295, %297 : vector<2x1xf32>
    %cst_232 = arith.constant 0.000000e+00 : f32
    %299 = vector.broadcast %cst_232 : f32 to vector<2x1xf32>
    %300 = arith.maximumf %298, %299 : vector<2x1xf32>
    %c3_233 = arith.constant 3 : index
    %301 = memref.load %arg4[%c3_233] : memref<5xf32, #tpu.memory_space<smem>>
    %302 = vector.broadcast %301 : f32 to vector<2x1xf32>
    %303 = arith.mulf %276, %302 : vector<2x1xf32>
    %c3_234 = arith.constant 3 : index
    %304 = memref.load %arg5[%c3_234] : memref<5xf32, #tpu.memory_space<smem>>
    %305 = vector.broadcast %304 : f32 to vector<2x1xf32>
    %306 = arith.addf %303, %305 : vector<2x1xf32>
    %cst_235 = arith.constant 0.000000e+00 : f32
    %307 = vector.broadcast %cst_235 : f32 to vector<2x1xf32>
    %308 = arith.maximumf %306, %307 : vector<2x1xf32>
    %c4_236 = arith.constant 4 : index
    %309 = memref.load %arg4[%c4_236] : memref<5xf32, #tpu.memory_space<smem>>
    %310 = vector.broadcast %309 : f32 to vector<2x1xf32>
    %311 = arith.mulf %276, %310 : vector<2x1xf32>
    %c4_237 = arith.constant 4 : index
    %312 = memref.load %arg5[%c4_237] : memref<5xf32, #tpu.memory_space<smem>>
    %313 = vector.broadcast %312 : f32 to vector<2x1xf32>
    %314 = arith.addf %311, %313 : vector<2x1xf32>
    %cst_238 = arith.constant 0.000000e+00 : f32
    %315 = vector.broadcast %cst_238 : f32 to vector<2x1xf32>
    %316 = arith.maximumf %314, %315 : vector<2x1xf32>
    %cst_239 = arith.constant 0.000000e+00 : f32
    %317 = vector.broadcast %cst_239 : f32 to vector<2x1xf32>
    %c0_240 = arith.constant 0 : index
    %318 = memref.load %arg7[%c0_240] : memref<2xf32, #tpu.memory_space<smem>>
    %319 = vector.broadcast %318 : f32 to vector<2x1xf32>
    %320 = arith.addf %317, %319 : vector<2x1xf32>
    %c0_241 = arith.constant 0 : index
    %c0_242 = arith.constant 0 : index
    %321 = memref.load %arg6[%c0_241, %c0_242] : memref<2x5xf32, #tpu.memory_space<smem>>
    %322 = vector.broadcast %321 : f32 to vector<2x1xf32>
    %323 = arith.mulf %284, %322 : vector<2x1xf32>
    %324 = arith.addf %320, %323 : vector<2x1xf32>
    %c0_243 = arith.constant 0 : index
    %c1_244 = arith.constant 1 : index
    %325 = memref.load %arg6[%c0_243, %c1_244] : memref<2x5xf32, #tpu.memory_space<smem>>
    %326 = vector.broadcast %325 : f32 to vector<2x1xf32>
    %327 = arith.mulf %292, %326 : vector<2x1xf32>
    %328 = arith.addf %324, %327 : vector<2x1xf32>
    %c0_245 = arith.constant 0 : index
    %c2_246 = arith.constant 2 : index
    %329 = memref.load %arg6[%c0_245, %c2_246] : memref<2x5xf32, #tpu.memory_space<smem>>
    %330 = vector.broadcast %329 : f32 to vector<2x1xf32>
    %331 = arith.mulf %300, %330 : vector<2x1xf32>
    %332 = arith.addf %328, %331 : vector<2x1xf32>
    %c0_247 = arith.constant 0 : index
    %c3_248 = arith.constant 3 : index
    %333 = memref.load %arg6[%c0_247, %c3_248] : memref<2x5xf32, #tpu.memory_space<smem>>
    %334 = vector.broadcast %333 : f32 to vector<2x1xf32>
    %335 = arith.mulf %308, %334 : vector<2x1xf32>
    %336 = arith.addf %332, %335 : vector<2x1xf32>
    %c0_249 = arith.constant 0 : index
    %c4_250 = arith.constant 4 : index
    %337 = memref.load %arg6[%c0_249, %c4_250] : memref<2x5xf32, #tpu.memory_space<smem>>
    %338 = vector.broadcast %337 : f32 to vector<2x1xf32>
    %339 = arith.mulf %316, %338 : vector<2x1xf32>
    %340 = arith.addf %336, %339 : vector<2x1xf32>
    %c0_251 = arith.constant 0 : index
    %c0_252 = arith.constant 0 : index
    %341 = vector.load %arg8[%c0_251, %c0_252] : memref<2x2xf32, #tpu.memory_space<vmem>>, vector<2x1xf32>
    tpu.vector_store %arg8[%c0_251, %c0_252], %340 {strides = array<i32>} : memref<2x2xf32, #tpu.memory_space<vmem>>, vector<2x1xf32>,
    %cst_253 = arith.constant 0.000000e+00 : f32
    %342 = vector.broadcast %cst_253 : f32 to vector<2x1xf32>
    %c1_254 = arith.constant 1 : index
    %343 = memref.load %arg7[%c1_254] : memref<2xf32, #tpu.memory_space<smem>>
    %344 = vector.broadcast %343 : f32 to vector<2x1xf32>
    %345 = arith.addf %342, %344 : vector<2x1xf32>
    %c1_255 = arith.constant 1 : index
    %c0_256 = arith.constant 0 : index
    %346 = memref.load %arg6[%c1_255, %c0_256] : memref<2x5xf32, #tpu.memory_space<smem>>
    %347 = vector.broadcast %346 : f32 to vector<2x1xf32>
    %348 = arith.mulf %284, %347 : vector<2x1xf32>
    %349 = arith.addf %345, %348 : vector<2x1xf32>
    %c1_257 = arith.constant 1 : index
    %c1_258 = arith.constant 1 : index
    %350 = memref.load %arg6[%c1_257, %c1_258] : memref<2x5xf32, #tpu.memory_space<smem>>
    %351 = vector.broadcast %350 : f32 to vector<2x1xf32>
    %352 = arith.mulf %292, %351 : vector<2x1xf32>
    %353 = arith.addf %349, %352 : vector<2x1xf32>
    %c1_259 = arith.constant 1 : index
    %c2_260 = arith.constant 2 : index
    %354 = memref.load %arg6[%c1_259, %c2_260] : memref<2x5xf32, #tpu.memory_space<smem>>
    %355 = vector.broadcast %354 : f32 to vector<2x1xf32>
    %356 = arith.mulf %300, %355 : vector<2x1xf32>
    %357 = arith.addf %353, %356 : vector<2x1xf32>
    %c1_261 = arith.constant 1 : index
    %c3_262 = arith.constant 3 : index
    %358 = memref.load %arg6[%c1_261, %c3_262] : memref<2x5xf32, #tpu.memory_space<smem>>
    %359 = vector.broadcast %358 : f32 to vector<2x1xf32>
    %360 = arith.mulf %308, %359 : vector<2x1xf32>
    %361 = arith.addf %357, %360 : vector<2x1xf32>
    %c1_263 = arith.constant 1 : index
    %c4_264 = arith.constant 4 : index
    %362 = memref.load %arg6[%c1_263, %c4_264] : memref<2x5xf32, #tpu.memory_space<smem>>
    %363 = vector.broadcast %362 : f32 to vector<2x1xf32>
    %364 = arith.mulf %316, %363 : vector<2x1xf32>
    %365 = arith.addf %361, %364 : vector<2x1xf32>
    %c0_265 = arith.constant 0 : index
    %c1_266 = arith.constant 1 : index
    %366 = vector.load %arg8[%c0_265, %c1_266] : memref<2x2xf32, #tpu.memory_space<vmem>>, vector<2x1xf32>
    tpu.vector_store %arg8[%c0_265, %c1_266], %365 {strides = array<i32>} : memref<2x2xf32, #tpu.memory_space<vmem>>, vector<2x1xf32>,
    return
  }
  func.func @transform_0(%arg0: i32) -> (i32, i32, i32) {
    %c0_i32 = arith.constant 0 : i32
    %c0_i32_0 = arith.constant 0 : i32
    %c0_i32_1 = arith.constant 0 : i32
    return %c0_i32, %arg0, %c0_i32_0 : i32, i32, i32
  }
  func.func @transform_1(%arg0: i32) -> (i32, i32) {
    %c0_i32 = arith.constant 0 : i32
    %c0_i32_0 = arith.constant 0 : i32
    %c0_i32_1 = arith.constant 0 : i32
    return %c0_i32, %c0_i32_0 : i32, i32
  }
  func.func @transform_2(%arg0: i32) -> i32 {
    %c0_i32 = arith.constant 0 : i32
    %c0_i32_0 = arith.constant 0 : i32
    return %c0_i32 : i32
  }
  func.func @transform_3(%arg0: i32) -> i32 {
    %c0_i32 = arith.constant 0 : i32
    %c0_i32_0 = arith.constant 0 : i32
    return %c0_i32 : i32
  }
  func.func @transform_4(%arg0: i32) -> i32 {
    %c0_i32 = arith.constant 0 : i32
    %c0_i32_0 = arith.constant 0 : i32
    return %c0_i32 : i32
  }
  func.func @transform_5(%arg0: i32) -> (i32, i32) {
    %c0_i32 = arith.constant 0 : i32
    %c0_i32_0 = arith.constant 0 : i32
    %c0_i32_1 = arith.constant 0 : i32
    return %c0_i32, %c0_i32_0 : i32, i32
  }
  func.func @transform_6(%arg0: i32) -> i32 {
    %c0_i32 = arith.constant 0 : i32
    %c0_i32_0 = arith.constant 0 : i32
    return %c0_i32 : i32
  }
  func.func @transform_7(%arg0: i32) -> (i32, i32) {
    %c0_i32 = arith.constant 0 : i32
    %c0_i32_0 = arith.constant 0 : i32
    return %arg0, %c0_i32 : i32, i32
  }
}

</mosaic_0001>

<bundles_post_ra>
// kernel: tpu_custom_call.1
= control target key start
LH: loop header
LB: loop body
LE: loop exit
PB: predicated region body
PF: predicated region fallthrough
CT: control target
= control target key end

     0   :  { %13 = vsyncpa [#allocation5], 0  ;;  %s1211_s0 = inlined_call_operand.hbm [shape: f32[4,2,150], index: 0, kind: input, shape index: {}]   ;;  %s1212_s1 = inlined_call_operand.vmem [shape: f32[4,11], index: 1, kind: input, shape index: {}]   ;;  %s1213_s2 = inlined_call_operand.<no memory space> [shape: f32[1], index: 2, kind: input, shape index: {}]   ;;  %s1214_s3 = inlined_call_operand.vmem [shape: f32[5], index: 3, kind: input, shape index: {}]   ;;  %s1215_s4 = inlined_call_operand.vmem [shape: f32[5], index: 4, kind: input, shape index: {}]   ;;  %s1216_s5 = inlined_call_operand.vmem [shape: f32[2,5], index: 5, kind: input, shape index: {}]   ;;  %s1217_s6 = inlined_call_operand.vmem [shape: f32[2], index: 6, kind: input, shape index: {}]   ;;  %s1218_s7 = inlined_call_operand.hbm [shape: f32[2,2], index: 7, kind: output, shape index: {}]  }
   0x1   :  { %14 = vsyncpa [#allocation7], 0 }
   0x2   :  { %15 = vsyncpa [#allocation10], 0 }
   0x3   :  { %16 = vsyncpa [#allocation13], 0  ;;  %s48_s26 = sshll.u32 %s1214_s3, 4  ;;  %s49_s26 = int_to_ptr.vmem [resolvable:$true] %s48_s26 }
   0x4   :  { %17 = vsyncpa [#allocation6], 0  ;;  %s68_s29 = sshll.u32 %s1216_s5, 4  ;;  %s788_s30 = scalar_lea.vmem %s49_s26, 16  ;;  %s69_s29 = int_to_ptr.vmem [resolvable:$true] %s68_s29 }
   0x5   :  { %p789_p0 = scmp.ne.s32.totalorder %s49_s26, %s788_s30  ;;  %p793_p1 = scmp.lt.s32.totalorder %s49_s26, %s49_s26 }
   0x6   :  { %p794_p2 = scmp.lt.s32.totalorder %s788_s30, %s788_s30 }
   0x8   :  { %p795_p3 = por %p794_p2, %p793_p1 }
   0xa   :  { %p796_p4 = pnand %p795_p3, %p789_p0 }
   0xc   :  { %799 = shalt.err (!%p796_p4)
}
   0xd   :  { %s902_s8 = smov [#allocation9]   ;;  %s800_s9 = scalar_lea.vmem %s69_s29, 32 }
   0xe   :  { %51 = dma.vmem_to_smem %s49_s26, 16, %s902_s8, [#allocation10]  }
   0xf   :  { %p801_p5 = scmp.ne.s32.totalorder %s69_s29, %s800_s9  ;;  %p805_p6 = scmp.lt.s32.totalorder %s69_s29, %s69_s29 }
  0x10   :  { %p806_p7 = scmp.lt.s32.totalorder %s800_s9, %s800_s9 }
  0x12   :  { %p807_p8 = por %p806_p7, %p805_p6 }
  0x14   :  { %p808_p9 = pnand %p807_p8, %p801_p5 }
  0x16   :  { %811 = shalt.err (!%p808_p9)
}
  0x17   :  { %s903_s3 = smov [#allocation12]   ;;  %s904_s5 = smov [#allocation4]  }
  0x18   :  { %71 = dma.vmem_to_smem %s69_s29, 32, %s903_s3, [#allocation13]  }
  0x19   :  { %s23_s10 = sshll.u32 %s904_s5, 4  ;;  %s36_s13 = sshll.u32 %s1212_s1, 4  ;;  %s24_s10 = int_to_ptr.vmem [resolvable:$true] %s23_s10  ;;  %s37_s13 = int_to_ptr.vmem [resolvable:$true] %s36_s13 }
  0x1a   :  { %s812_s16 = scalar_lea.hbm %s1211_s0, 256 }
  0x1b   :  { %p813_p10 = scmp.ne.s32.totalorder %s1211_s0, %s812_s16  ;;  %p816_p11 = scmp.lt.u32.totalorder %s812_s16, %s1211_s0 }
  0x1d   :  { %p818_p12 = pnand %p816_p11, %p813_p10 }
  0x1f   :  { %821 = shalt.err (!%p818_p12)
}
  0x20   :  { %s822_s21 = scalar_lea.vmem %s24_s10, 256  ;;  %p827_p0 = scmp.lt.s32.totalorder %s24_s10, %s24_s10 }
  0x21   :  { %p823_p13 = scmp.ne.s32.totalorder %s24_s10, %s822_s21  ;;  %p828_p1 = scmp.lt.s32.totalorder %s822_s21, %s822_s21 }
  0x23   :  { %p829_p2 = por %p828_p1, %p827_p0 }
  0x25   :  { %p830_p3 = pnand %p829_p2, %p823_p13 }
  0x27   :  { %833 = shalt.err (!%p830_p3)
}
  0x28   :  { %s905_s1 = smov 64   ;;  %s906_s22 = smov 4  }
  0x29   :  { %29 = dma.hbm_to_vmem [thread:$0]  %s1211_s0, 256, %s24_s10, [#allocation5], %s905_s1, %s905_s1, %s906_s22  }
  0x2a   :  { %s834_s25 = scalar_lea.vmem %s37_s13, 64  ;;  %p839_p5 = scmp.lt.s32.totalorder %s37_s13, %s37_s13 }
  0x2b   :  { %p835_p4 = scmp.ne.s32.totalorder %s37_s13, %s834_s25  ;;  %p840_p6 = scmp.lt.s32.totalorder %s834_s25, %s834_s25 }
  0x2d   :  { %p841_p7 = por %p840_p6, %p839_p5 }
  0x2f   :  { %p842_p8 = pnand %p841_p7, %p835_p4 }
  0x31   :  { %845 = shalt.err (!%p842_p8)
}
  0x32   :  { %s907_s26 = smov [#allocation8]   ;;  %s58_s29 = sshll.u32 %s1215_s4, 4  ;;  %s59_s29 = int_to_ptr.vmem [resolvable:$true] %s58_s29 }
  0x33   :  { %39 = dma.vmem_to_smem %s37_s13, 64, %s907_s26, [#allocation7]  }
  0x34   :  { %s78_s9 = sshll.u32 %s1217_s6, 4  ;;  %s846_s0 = scalar_lea.vmem %s59_s29, 16  ;;  %s79_s9 = int_to_ptr.vmem [resolvable:$true] %s78_s9 }
  0x35   :  { %p847_p9 = scmp.ne.s32.totalorder %s59_s29, %s846_s0  ;;  %p851_p10 = scmp.lt.s32.totalorder %s59_s29, %s59_s29 }
  0x36   :  { %p852_p11 = scmp.lt.s32.totalorder %s846_s0, %s846_s0 }
  0x38   :  { %p853_p12 = por %p852_p11, %p851_p10 }
  0x3a   :  { %p854_p13 = pnand %p853_p12, %p847_p9 }
  0x3c   :  { %857 = shalt.err (!%p854_p13)
}
  0x3d   :  { %s908_s3 = smov [#allocation11]   ;;  %s858_s5 = scalar_lea.vmem %s79_s9, 16 }
  0x3e   :  { %61 = dma.vmem_to_smem %s59_s29, 16, %s908_s3, [#allocation10]  }
  0x3f   :  { %p859_p0 = scmp.ne.s32.totalorder %s79_s9, %s858_s5  ;;  %p863_p1 = scmp.lt.s32.totalorder %s79_s9, %s79_s9 }
  0x40   :  { %p864_p2 = scmp.lt.s32.totalorder %s858_s5, %s858_s5 }
  0x42   :  { %p865_p3 = por %p864_p2, %p863_p1 }
  0x44   :  { %p866_p4 = pnand %p865_p3, %p859_p0 }
  0x46   :  { %869 = shalt.err (!%p866_p4)
}
  0x47   :  { %s909_s4 = smov [#allocation14]  }
  0x48   :  { %81 = dma.vmem_to_smem %s79_s9, 16, %s909_s4, [#allocation13]  }
  0x49   :  { %892 = dma.done.wait [#allocation5], 256  }
  0x4a   :  { %893 = vsyncadd [#allocation5], 4294967040 }
  0x4b   :  { %894 = dma.done.wait [#allocation7], 64  }
  0x4c   :  { %895 = vsyncadd [#allocation7], 4294967232 }
  0x4d   :  { %896 = dma.done.wait [#allocation10], 32  }
  0x4e   :  { %897 = vsyncadd [#allocation10], 4294967264 }
  0x4f   :  { %898 = dma.done.wait [#allocation13], 48  }
  0x50   :  { %899 = vsyncadd [#allocation13], 4294967248 }
  0x51   :  { %100 = sfence }
  0x52   :  { %v111_v0 = vld [vmem:[#allocation4] sm:$0xf]  ;;  %s910_s6 = smov 5   ;;  %v113_v1 = vld [vmem:[#allocation4 + $0x8] sm:$0xf]  ;;  %vm101_vm0 = vcmask 33792  }
  0x53   :  { %119 = vrot.lane.b32.xlu0 %v111_v0, %s910_s6  ;;  %v112_v2 = vld [vmem:[#allocation4 + $0x4] sm:$0xf]  ;;  %123 = vrot.lane.b32.xlu1 %v113_v1, %s910_s6  ;;  %vm106_vm1 = vcmask 255192   ;;  %v114_v3 = vld [vmem:[#allocation4 + $0xc] sm:$0xf]  ;;  %v911_v4 = vmov 0.0  }
  0x54   :  { %102 = vst.msk [vmem:[#allocation2] sm:$0x3] %vm101_vm0, %v911_v4  ;;  %103 = vst.msk [vmem:[#allocation2 + $0x4] sm:$0x3] %vm101_vm0, %v911_v4  ;;  %vm140_vm2 = vcmask 1041448   ;;  %vm141_vm3 = vcmask 216066  }
  0x55   :  { %107 = vst.msk [vmem:[#allocation2 + $0x2] sm:$0x3] %vm106_vm1, %v911_v4  ;;  %108 = vst.msk [vmem:[#allocation2 + $0x6] sm:$0x3] %vm106_vm1, %v911_v4  ;;  %vm131_vm4 = vcmask 39936   ;;  %s706_s10 = sld [smem:[#allocation8 + $0x2]] }
  0x56   :  { %104 = vst.msk [vmem:[#allocation2 + $0x8] sm:$0x3] %vm101_vm0, %v911_v4  ;;  %105 = vst.msk [vmem:[#allocation2 + $0xc] sm:$0x3] %vm101_vm0, %v911_v4  ;;  %s705_s11 = sld [smem:[#allocation8 + $0x1]]  ;;  %s708_s12 = sld [smem:[#allocation8 + $0x4]] }
  0x57   :  { %109 = vst.msk [vmem:[#allocation2 + $0xa] sm:$0x3] %vm106_vm1, %v911_v4  ;;  %110 = vst.msk [vmem:[#allocation2 + $0xe] sm:$0x3] %vm106_vm1, %v911_v4  ;;  %121 = vrot.lane.b32.xlu0 %v112_v2, %s910_s6  ;;  %125 = vrot.lane.b32.xlu1 %v114_v3, %s910_s6  ;;  %s707_s13 = sld [smem:[#allocation8 + $0x3]]  ;;  %s710_s14 = sld [smem:[#allocation8 + $0x6]] }
  0x58   :  { %vm991_vm5 = vmor %vm141_vm3, %vm140_vm2  ;;  %s709_s15 = sld [smem:[#allocation8 + $0x5]]  ;;  %s712_s16 = sld [smem:[#allocation8 + $0x8]]  ;;  %vm162_vm6 = vcmask 1039360   ;;  %vm173_vm7 = vcmask 1031168   ;;  %vm184_vm8 = vcmask 1022976   ;;  %vm195_vm9 = vcmask 1014784  }
  0x59   :  { %s711_s17 = sld [smem:[#allocation8 + $0x7]]  ;;  %s912_s18 = smov 126   ;;  %vm206_vm10 = vcmask 1006592   ;;  %vm217_vm11 = vcmask 998400   ;;  %vm228_vm12 = vcmask 990208   ;;  %vm239_vm13 = vcmask 982016  }
  0x5a   :  { %s913_s19 = smov 127   ;;  %s714_s20 = sld [smem:[#allocation8 + $0xa]]  ;;  %vm250_vm14 = vcmask 973824   ;;  %vm261_vm15 = vcmask 965632   ;;  %vm595_vm0 = vcmask 1041408   ;;  %vm597_vm1 = vcmask 173056  }
  0x5b   :  { %v167_v18 = vstv %s706_s10  ;;  %s713_s21 = sld [smem:[#allocation8 + $0x9]]  ;;  %s914_s1 = smov 124   ;;  %vm660_vm2 = vcmask 1024   ;;  %vm685_vm3 = vcmask 9224  }
  0x5c   :  { %v156_v19 = vstv %s705_s11  ;;  %v189_v23 = vstv %s708_s12  ;;  %s915_s22 = smov 125   ;;  %s1017_s23 = sld [smem:[#allocation8 + $0x82]] }
  0x5d   :  { %v178_v24 = vstv %s707_s13  ;;  %v211_v27 = vstv %s710_s14  ;;  %s1019_s24 = sld [smem:[#allocation8 + $0x81]]  ;;  %s916_s25 = smov 122  }
  0x5e   :  { %v200_v28 = vstv %s709_s15  ;;  %v233_v31 = vstv %s712_s16  ;;  %s917_s26 = smov 123   ;;  %s719_s27 = sld [smem:[#allocation8 + $0x84]] }
  0x5f   :  { %v222_v32 = vstv %s711_s17  ;;  %s718_s28 = sld [smem:[#allocation8 + $0x83]]  ;;  %s918_s29 = smov 120  }
  0x60   :  { %v255_v35 = vstv %s714_s20  ;;  %s919_s30 = smov 121   ;;  %s721_s8 = sld [smem:[#allocation8 + $0x86]] }
  0x61   :  { %v244_v36 = vstv %s713_s21  ;;  %s720_s9 = sld [smem:[#allocation8 + $0x85]]  ;;  %s920_s0 = smov 118  }
  0x62   :  { %v282_v38 = vstv %s1017_s23  ;;  %s921_s3 = smov 119   ;;  %s723_s5 = sld [smem:[#allocation8 + $0x88]] }
  0x63   :  { %v272_v39 = vstv %s1019_s24  ;;  %s722_s4 = sld [smem:[#allocation8 + $0x87]]  ;;  %s725_s6 = sld [smem:[#allocation8 + $0x8a]] }
  0x64   :  { %v302_v44 = vstv %s719_s27  ;;  %s724_s10 = sld [smem:[#allocation8 + $0x89]]  ;;  %s728_s11 = sld [smem:[#allocation8 + $0x102]] }
  0x65   :  { %v292_v45 = vstv %s718_s28  ;;  %s727_s12 = sld [smem:[#allocation8 + $0x101]]  ;;  %s730_s13 = sld [smem:[#allocation8 + $0x104]] }
  0x66   :  { %v322_v48 = vstv %s721_s8  ;;  %s729_s14 = sld [smem:[#allocation8 + $0x103]]  ;;  %s732_s15 = sld [smem:[#allocation8 + $0x106]] }
  0x67   :  { %v312_v49 = vstv %s720_s9  ;;  %s731_s16 = sld [smem:[#allocation8 + $0x105]]  ;;  %s734_s17 = sld [smem:[#allocation8 + $0x108]] }
  0x68   :  { %v342_v52 = vstv %s723_s5  ;;  %s733_s20 = sld [smem:[#allocation8 + $0x107]]  ;;  %s736_s21 = sld [smem:[#allocation8 + $0x10a]] }
  0x69   :  { %v332_v53 = vstv %s722_s4  ;;  %v362_v56 = vstv %s725_s6  ;;  %s735_s23 = sld [smem:[#allocation8 + $0x109]]  ;;  %s739_s24 = sld [smem:[#allocation8 + $0x182]] }
  0x6a   :  { %v352_v57 = vstv %s724_s10  ;;  %v388_v59 = vstv %s728_s11  ;;  %s738_s27 = sld [smem:[#allocation8 + $0x181]]  ;;  %s741_s28 = sld [smem:[#allocation8 + $0x184]] }
  0x6b   :  { %v378_v60 = vstv %s727_s12  ;;  %v408_v1 = vstv %s730_s13  ;;  %s740_s8 = sld [smem:[#allocation8 + $0x183]]  ;;  %s743_s9 = sld [smem:[#allocation8 + $0x186]] }
  0x6c   :  { %v398_v2 = vstv %s729_s14  ;;  %s742_s5 = sld [smem:[#allocation8 + $0x185]]  ;;  %s745_s4 = sld [smem:[#allocation8 + $0x188]] }
  0x6d   :  { %v418_v6 = vstv %s731_s16  ;;  %s744_s6 = sld [smem:[#allocation8 + $0x187]]  ;;  %s747_s10 = sld [smem:[#allocation8 + $0x18a]] }
  0x6e   :  { %s746_s11 = sld [smem:[#allocation8 + $0x189]]  ;;  %s754_s13 = sld [smem:[#allocation9 + $0x4]] }
  0x6f   :  { %s1150_s12 = sld [smem:[#allocation11 + $0x1]]  ;;  %s1152_s14 = sld [smem:[#allocation11 + $0x2]] }
  0x70   :  { %s1156_s16 = sld [smem:[#allocation11 + $0x4]] }
  0xc5   :  { %v120_v5 = vpop.permute.xlu0 %119  ;;  %v124_v8 = vpop.permute.xlu1 %123 }
  0xc6   :  { %v127_v7 = vrot.slane %v120_v5, 6  ;;  %v129_v9 = vrot.slane %v124_v8, 6 }
  0xc8   :  { %v132_v10 = vsel %vm131_vm4, %v127_v7, %v120_v5  ;;  %v134_v12 = vsel %vm131_vm4, %v129_v9, %v124_v8  ;;  %v428_v5 = vstv %s732_s15  ;;  %v448_v9 = vstv %s734_s17  ;;  %s1154_s15 = sld [smem:[#allocation11 + $0x3]]  ;;  %s1158_s17 = sld [smem:[#allocation12]] }
  0xc9   :  { %143 = vst.msk [vmem:[#allocation2] sm:$0xf] %vm991_vm5, %v132_v10  ;;  %v122_v11 = vpop.permute.xlu0 %121  ;;  %145 = vst.msk [vmem:[#allocation2 + $0x8] sm:$0xf] %vm991_vm5, %v134_v12  ;;  %v126_v14 = vpop.permute.xlu1 %125  ;;  %v438_v10 = vstv %s733_s20  ;;  %s1160_s20 = sld [smem:[#allocation12 + $0x80]] }
  0xca   :  { %v128_v13 = vrot.slane %v122_v11, 6  ;;  %v130_v15 = vrot.slane %v126_v14, 6 }
  0xcc   :  { %v133_v16 = vsel %vm131_vm4, %v128_v13, %v122_v11  ;;  %v135_v17 = vsel %vm131_vm4, %v130_v15, %v126_v14  ;;  %v468_v13 = vstv %s736_s21  ;;  %v458_v14 = vstv %s735_s23  ;;  %s1162_s21 = sld [smem:[#allocation14]]  ;;  %s1164_s23 = sld [smem:[#allocation12 + $0x1]] }
  0xcd   :  { %144 = vst.msk [vmem:[#allocation2 + $0x4] sm:$0xf] %vm991_vm5, %v133_v16  ;;  %146 = vst.msk [vmem:[#allocation2 + $0xc] sm:$0xf] %vm991_vm5, %v135_v17  ;;  %v494_v16 = vstv %s739_s24  ;;  %v484_v17 = vstv %s738_s27  ;;  %s1166_s24 = sld [smem:[#allocation14 + $0x1]] }
  0xce   :  { %s1168_s27 = sld [smem:[#allocation12 + $0x81]] }
  0xd0   :  { %v1007_v20 = vld [vmem:[#allocation2] sm:$0xf]  ;;  %v1053_v58 = vld [vmem:[#allocation2 + $0x8] sm:$0xf] }
  0xd1   :  { %v168_v21 = vmul.f32 %v167_v18, %v1007_v20  ;;  %v157_v22 = vmul.f32 %v156_v19, %v1007_v20  ;;  %v190_v25 = vmul.f32 %v189_v23, %v1007_v20  ;;  %v179_v26 = vmul.f32 %v178_v24, %v1007_v20 }
  0xd2   :  { %v212_v29 = vmul.f32 %v211_v27, %v1007_v20  ;;  %v201_v30 = vmul.f32 %v200_v28, %v1007_v20  ;;  %v234_v33 = vmul.f32 %v233_v31, %v1007_v20  ;;  %v223_v34 = vmul.f32 %v222_v32, %v1007_v20 }
  0xd3   :  { %170 = vrot.lane.b32.xlu1 %v168_v21, %s912_s18  ;;  %159 = vrot.lane.b32.xlu0 %v157_v22, %s913_s19  ;;  %v256_v40 = vmul.f32 %v255_v35, %v1007_v20  ;;  %v245_v41 = vmul.f32 %v244_v36, %v1007_v20  ;;  %v389_v63 = vmul.f32 %v388_v59, %v1053_v58  ;;  %v514_v23 = vstv %s741_s28  ;;  %s1174_s28 = sld [smem:[#allocation12 + $0x2]] }
  0xd4   :  { %v1029_v37 = vld [vmem:[#allocation2 + $0x4] sm:$0xf]  ;;  %v379_v0 = vmul.f32 %v378_v60, %v1053_v58  ;;  %v409_v3 = vmul.f32 %v408_v1, %v1053_v58  ;;  %v399_v4 = vmul.f32 %v398_v2, %v1053_v58  ;;  %v429_v7 = vmul.f32 %v428_v5, %v1053_v58  ;;  %v1075_v15 = vld [vmem:[#allocation2 + $0xc] sm:$0xf] }
  0xd5   :  { %v283_v42 = vmul.f32 %v282_v38, %v1029_v37  ;;  %v273_v43 = vmul.f32 %v272_v39, %v1029_v37  ;;  %v303_v46 = vmul.f32 %v302_v44, %v1029_v37  ;;  %v293_v47 = vmul.f32 %v292_v45, %v1029_v37 }
  0xd6   :  { %v323_v50 = vmul.f32 %v322_v48, %v1029_v37  ;;  %v313_v51 = vmul.f32 %v312_v49, %v1029_v37  ;;  %v343_v54 = vmul.f32 %v342_v52, %v1029_v37  ;;  %v333_v55 = vmul.f32 %v332_v53, %v1029_v37 }
  0xd7   :  { %192 = vrot.lane.b32.xlu1 %v190_v25, %s914_s1  ;;  %181 = vrot.lane.b32.xlu0 %v179_v26, %s915_s22  ;;  %v363_v61 = vmul.f32 %v362_v56, %v1029_v37  ;;  %v353_v62 = vmul.f32 %v352_v57, %v1029_v37  ;;  %v419_v8 = vmul.f32 %v418_v6, %v1053_v58  ;;  %v504_v24 = vstv %s740_s8  ;;  %s1176_s8 = sld [smem:[#allocation12 + $0x82]] }
  0xd8   :  { %v449_v11 = vmul.f32 %v448_v9, %v1053_v58  ;;  %v439_v12 = vmul.f32 %v438_v10, %v1053_v58  ;;  %v469_v18 = vmul.f32 %v468_v13, %v1053_v58  ;;  %v459_v19 = vmul.f32 %v458_v14, %v1053_v58 }
  0xd9   :  { %v495_v21 = vmul.f32 %v494_v16, %v1075_v15  ;;  %v485_v22 = vmul.f32 %v484_v17, %v1075_v15  ;;  %v515_v25 = vmul.f32 %v514_v23, %v1075_v15  ;;  %v505_v26 = vmul.f32 %v504_v24, %v1075_v15 }
  0xda   :  { %v534_v27 = vstv %s743_s9  ;;  %v524_v28 = vstv %s742_s5  ;;  %v554_v31 = vstv %s745_s4  ;;  %v544_v32 = vstv %s744_s6  ;;  %s1178_s9 = sld [smem:[#allocation12 + $0x3]]  ;;  %s1185_s4 = sld [smem:[#allocation12 + $0x4]] }
  0xdb   :  { %214 = vrot.lane.b32.xlu1 %v212_v29, %s916_s25  ;;  %203 = vrot.lane.b32.xlu0 %v201_v30, %s917_s26  ;;  %v535_v29 = vmul.f32 %v534_v27, %v1075_v15  ;;  %v525_v30 = vmul.f32 %v524_v28, %v1075_v15  ;;  %v574_v35 = vstv %s747_s10  ;;  %v564_v36 = vstv %s746_s11  ;;  %s1180_s5 = sld [smem:[#allocation12 + $0x83]]  ;;  %s1187_s6 = sld [smem:[#allocation12 + $0x84]] }
  0xdc   :  { %v575_v38 = vmul.f32 %v574_v35, %v1075_v15  ;;  %v565_v39 = vmul.f32 %v564_v36, %v1075_v15  ;;  %s923_s10 = smov [#allocation15]  }
  0xdd   :  { %s693_s11 = sshll.u32 %s923_s10, 4  ;;  %s694_s11 = int_to_ptr.vmem [resolvable:$true] %s693_s11 }
  0xde   :  { %p875_p6 = scmp.lt.s32.totalorder %s694_s11, %s694_s11 }
  0xdf   :  { %236 = vrot.lane.b32.xlu1 %v234_v33, %s918_s29  ;;  %225 = vrot.lane.b32.xlu0 %v223_v34, %s919_s30  ;;  %v555_v33 = vmul.f32 %v554_v31, %v1075_v15  ;;  %v545_v34 = vmul.f32 %v544_v32, %v1075_v15 }
  0xe3   :  { %258 = vrot.lane.b32.xlu1 %v256_v40, %s920_s0  ;;  %247 = vrot.lane.b32.xlu0 %v245_v41, %s921_s3 }
  0xe7   :  { %285 = vrot.lane.b32.xlu1 %v283_v42, %s912_s18  ;;  %275 = vrot.lane.b32.xlu0 %v273_v43, %s913_s19  ;;  %v148_v42 = vstv %s1213_s2  ;;  %s715_s2 = sld [smem:[#allocation8 + $0x80]] }
  0xeb   :  { %305 = vrot.lane.b32.xlu1 %v303_v46, %s914_s1  ;;  %295 = vrot.lane.b32.xlu0 %v293_v47, %s915_s22 }
  0xef   :  { %325 = vrot.lane.b32.xlu1 %v323_v50, %s916_s25  ;;  %315 = vrot.lane.b32.xlu0 %v313_v51, %s917_s26 }
  0xf3   :  { %345 = vrot.lane.b32.xlu1 %v343_v54, %s918_s29  ;;  %335 = vrot.lane.b32.xlu0 %v333_v55, %s919_s30 }
  0xf7   :  { %365 = vrot.lane.b32.xlu1 %v363_v61, %s920_s0  ;;  %355 = vrot.lane.b32.xlu0 %v353_v62, %s921_s3 }
  0xfb   :  { %391 = vrot.lane.b32.xlu1 %v389_v63, %s912_s18  ;;  %381 = vrot.lane.b32.xlu0 %v379_v0, %s913_s19 }
  0xff   :  { %411 = vrot.lane.b32.xlu1 %v409_v3, %s914_s1  ;;  %401 = vrot.lane.b32.xlu0 %v399_v4, %s915_s22 }
 0x103   :  { %431 = vrot.lane.b32.xlu1 %v429_v7, %s916_s25  ;;  %421 = vrot.lane.b32.xlu0 %v419_v8, %s917_s26 }
 0x107   :  { %451 = vrot.lane.b32.xlu1 %v449_v11, %s918_s29  ;;  %441 = vrot.lane.b32.xlu0 %v439_v12, %s919_s30 }
 0x10b   :  { %471 = vrot.lane.b32.xlu1 %v469_v18, %s920_s0  ;;  %461 = vrot.lane.b32.xlu0 %v459_v19, %s921_s3  ;;  %v268_v18 = vstv %s715_s2 }
 0x10f   :  { %497 = vrot.lane.b32.xlu1 %v495_v21, %s912_s18  ;;  %487 = vrot.lane.b32.xlu0 %v485_v22, %s913_s19  ;;  %s151_s18 = sld [smem:[#allocation8]] }
 0x113   :  { %517 = vrot.lane.b32.xlu1 %v515_v25, %s914_s1  ;;  %507 = vrot.lane.b32.xlu0 %v505_v26, %s915_s22  ;;  %v269_v26 = vmul.f32 %v268_v18, %v1029_v37  ;;  %s726_s22 = sld [smem:[#allocation8 + $0x100]] }
 0x115   :  { %v152_v40 = vstv %s151_s18  ;;  %s870_s18 = scalar_lea.vmem %s694_s11, 32 }
 0x116   :  { %v153_v41 = vmul.f32 %v152_v40, %v1007_v20  ;;  %p871_p5 = scmp.ne.s32.totalorder %s694_s11, %s870_s18  ;;  %p876_p7 = scmp.lt.s32.totalorder %s870_s18, %s870_s18 }
 0x117   :  { %537 = vrot.lane.b32.xlu1 %v535_v29, %s916_s25  ;;  %527 = vrot.lane.b32.xlu0 %v525_v30, %s917_s26  ;;  %s737_s25 = sld [smem:[#allocation8 + $0x180]] }
 0x118   :  { %v154_v47 = vadd.f32 %v153_v41, %v148_v42  ;;  %s602_s26 = sld [smem:[#allocation9]]  ;;  %p877_p8 = por %p876_p7, %p875_p6 }
 0x11a   :  { %p878_p9 = pnand %p877_p8, %p871_p5 }
 0x11b   :  { %557 = vrot.lane.b32.xlu1 %v555_v33, %s918_s29  ;;  %547 = vrot.lane.b32.xlu0 %v545_v34, %s919_s30  ;;  %s1148_s29 = sld [smem:[#allocation11]]  ;;  %s748_s30 = sld [smem:[#allocation9 + $0x1]] }
 0x11f   :  { %577 = vrot.lane.b32.xlu1 %v575_v38, %s920_s0  ;;  %567 = vrot.lane.b32.xlu0 %v565_v39, %s921_s3  ;;  %s750_s0 = sld [smem:[#allocation9 + $0x2]]  ;;  %s752_s3 = sld [smem:[#allocation9 + $0x3]] }
 0x145   :  { %v171_v43 = vpop.permute.xlu1 %170  ;;  %v160_v44 = vpop.permute.xlu0 %159 }
 0x146   :  { %v172_v45 = vrot.slane %v171_v43, 2  ;;  %v161_v46 = vrot.slane %v160_v44, 2 }
 0x148   :  { %v163_v48 = vsel %vm162_vm6, %v160_v44, %v161_v46  ;;  %v174_v52 = vsel %vm173_vm7, %v171_v43, %v172_v45 }
 0x149   :  { %v165_v49 = vadd.f32 %v163_v48, %v154_v47  ;;  %v193_v50 = vpop.permute.xlu1 %192  ;;  %v182_v51 = vpop.permute.xlu0 %181 }
 0x14a   :  { %v194_v20 = vrot.slane %v193_v50, 2  ;;  %v183_v53 = vrot.slane %v182_v51, 2 }
 0x14b   :  { %v176_v54 = vadd.f32 %v174_v52, %v165_v49 }
 0x14c   :  { %v185_v55 = vsel %vm184_vm8, %v182_v51, %v183_v53  ;;  %v196_v60 = vsel %vm195_vm9, %v193_v50, %v194_v20 }
 0x14d   :  { %v187_v56 = vadd.f32 %v185_v55, %v176_v54  ;;  %v215_v57 = vpop.permute.xlu1 %214  ;;  %v204_v59 = vpop.permute.xlu0 %203 }
 0x14e   :  { %v216_v61 = vrot.slane %v215_v57, 2  ;;  %v205_v62 = vrot.slane %v204_v59, 2 }
 0x14f   :  { %v198_v63 = vadd.f32 %v196_v60, %v187_v56 }
 0x150   :  { %v207_v0 = vsel %vm206_vm10, %v204_v59, %v205_v62  ;;  %v218_v4 = vsel %vm217_vm11, %v215_v57, %v216_v61 }
 0x151   :  { %v209_v1 = vadd.f32 %v207_v0, %v198_v63  ;;  %v237_v2 = vpop.permute.xlu1 %236  ;;  %v226_v3 = vpop.permute.xlu0 %225  ;;  %v374_v0 = vstv %s726_s22 }
 0x152   :  { %v238_v5 = vrot.slane %v237_v2, 2  ;;  %v227_v6 = vrot.slane %v226_v3, 2 }
 0x153   :  { %v220_v7 = vadd.f32 %v218_v4, %v209_v1 }
 0x154   :  { %v229_v8 = vsel %vm228_vm12, %v226_v3, %v227_v6  ;;  %v240_v12 = vsel %vm239_vm13, %v237_v2, %v238_v5  ;;  %v375_v5 = vmul.f32 %v374_v0, %v1053_v58 }
 0x155   :  { %v231_v9 = vadd.f32 %v229_v8, %v220_v7  ;;  %v259_v10 = vpop.permute.xlu1 %258  ;;  %v248_v11 = vpop.permute.xlu0 %247 }
 0x156   :  { %v260_v13 = vrot.slane %v259_v10, 2  ;;  %v249_v14 = vrot.slane %v248_v11, 2 }
 0x157   :  { %v242_v16 = vadd.f32 %v240_v12, %v231_v9 }
 0x158   :  { %v251_v17 = vsel %vm250_vm14, %v248_v11, %v249_v14  ;;  %v262_v23 = vsel %vm261_vm15, %v259_v10, %v260_v13 }
 0x159   :  { %v253_v19 = vadd.f32 %v251_v17, %v242_v16  ;;  %v286_v21 = vpop.permute.xlu1 %285  ;;  %v276_v22 = vpop.permute.xlu0 %275 }
 0x15a   :  { %v277_v24 = vrot.slane %v276_v22, 2  ;;  %v287_v27 = vrot.slane %v286_v21, 2 }
 0x15b   :  { %v264_v25 = vadd.f32 %v262_v23, %v253_v19 }
 0x15c   :  { %v278_v31 = vsel %vm162_vm6, %v276_v22, %v277_v24  ;;  %v288_v34 = vsel %vm173_vm7, %v286_v21, %v287_v27 }
 0x15d   :  { %v270_v28 = vadd.f32 %v269_v26, %v264_v25  ;;  %v306_v29 = vpop.permute.xlu1 %305  ;;  %v296_v30 = vpop.permute.xlu0 %295 }
 0x15e   :  { %v297_v32 = vrot.slane %v296_v30, 2  ;;  %v307_v35 = vrot.slane %v306_v29, 2 }
 0x15f   :  { %v280_v33 = vadd.f32 %v278_v31, %v270_v28 }
 0x160   :  { %v298_v40 = vsel %vm184_vm8, %v296_v30, %v297_v32  ;;  %v308_v37 = vsel %vm195_vm9, %v306_v29, %v307_v35 }
 0x161   :  { %v290_v36 = vadd.f32 %v288_v34, %v280_v33  ;;  %v326_v38 = vpop.permute.xlu1 %325  ;;  %v316_v39 = vpop.permute.xlu0 %315 }
 0x162   :  { %v317_v41 = vrot.slane %v316_v39, 2  ;;  %v327_v43 = vrot.slane %v326_v38, 2 }
 0x163   :  { %v300_v42 = vadd.f32 %v298_v40, %v290_v36 }
 0x164   :  { %v318_v47 = vsel %vm206_vm10, %v316_v39, %v317_v41  ;;  %v328_v50 = vsel %vm217_vm11, %v326_v38, %v327_v43 }
 0x165   :  { %v310_v44 = vadd.f32 %v308_v37, %v300_v42  ;;  %v346_v45 = vpop.permute.xlu1 %345  ;;  %v336_v46 = vpop.permute.xlu0 %335 }
 0x166   :  { %v337_v48 = vrot.slane %v336_v46, 2  ;;  %v347_v51 = vrot.slane %v346_v45, 2 }
 0x167   :  { %v320_v49 = vadd.f32 %v318_v47, %v310_v44  ;;  %v480_v44 = vstv %s737_s25 }
 0x168   :  { %v338_v54 = vsel %vm228_vm12, %v336_v46, %v337_v48  ;;  %v348_v57 = vsel %vm239_vm13, %v346_v45, %v347_v51  ;;  %v481_v51 = vmul.f32 %v480_v44, %v1075_v15  ;;  %v627_v44 = vstv %s1154_s15 }
 0x169   :  { %v330_v52 = vadd.f32 %v328_v50, %v320_v49  ;;  %v366_v20 = vpop.permute.xlu1 %365  ;;  %v356_v53 = vpop.permute.xlu0 %355 }
 0x16a   :  { %v357_v55 = vrot.slane %v356_v53, 2  ;;  %v367_v59 = vrot.slane %v366_v20, 2 }
 0x16b   :  { %v340_v56 = vadd.f32 %v338_v54, %v330_v52 }
 0x16c   :  { %v358_v63 = vsel %vm250_vm14, %v356_v53, %v357_v55  ;;  %v368_v2 = vsel %vm261_vm15, %v366_v20, %v367_v59 }
 0x16d   :  { %v350_v60 = vadd.f32 %v348_v57, %v340_v56  ;;  %v392_v61 = vpop.permute.xlu1 %391  ;;  %v382_v62 = vpop.permute.xlu0 %381 }
 0x16e   :  { %v383_v3 = vrot.slane %v382_v62, 2  ;;  %v393_v8 = vrot.slane %v392_v61, 2 }
 0x16f   :  { %v360_v1 = vadd.f32 %v358_v63, %v350_v60 }
 0x170   :  { %v384_v10 = vsel %vm162_vm6, %v382_v62, %v383_v3  ;;  %v394_v16 = vsel %vm173_vm7, %v392_v61, %v393_v8 }
 0x171   :  { %v370_v4 = vadd.f32 %v368_v2, %v360_v1  ;;  %v412_v6 = vpop.permute.xlu1 %411  ;;  %v402_v7 = vpop.permute.xlu0 %401 }
 0x172   :  { %v403_v11 = vrot.slane %v402_v7, 2  ;;  %v413_v17 = vrot.slane %v412_v6, 2 }
 0x173   :  { %v376_v9 = vadd.f32 %v375_v5, %v370_v4 }
 0x174   :  { %v404_v19 = vsel %vm184_vm8, %v402_v7, %v403_v11  ;;  %v414_v24 = vsel %vm195_vm9, %v412_v6, %v413_v17 }
 0x175   :  { %v386_v12 = vadd.f32 %v384_v10, %v376_v9  ;;  %v432_v13 = vpop.permute.xlu1 %431  ;;  %v422_v14 = vpop.permute.xlu0 %421 }
 0x176   :  { %v423_v21 = vrot.slane %v422_v14, 2  ;;  %v433_v25 = vrot.slane %v432_v13, 2 }
 0x177   :  { %v396_v18 = vadd.f32 %v394_v16, %v386_v12  ;;  %v588_v16 = vlaneseq }
 0x178   :  { %v424_v27 = vsel %vm206_vm10, %v422_v14, %v423_v21  ;;  %v434_v32 = vsel %vm217_vm11, %v432_v13, %v433_v25  ;;  %v922_v13 = vmov 1983009808  }
 0x179   :  { %v406_v22 = vadd.f32 %v404_v19, %v396_v18  ;;  %v452_v23 = vpop.permute.xlu1 %451  ;;  %v442_v58 = vpop.permute.xlu0 %441  ;;  %v586_v14 = vunpack.c.l.s4 %v922_v13 }
 0x17a   :  { %v443_v28 = vrot.slane %v442_v58, 2  ;;  %v453_v33 = vrot.slane %v452_v23, 2 }
 0x17b   :  { %v416_v26 = vadd.f32 %v414_v24, %v406_v22  ;;  %v589_v24 = vshrl.u32 %v588_v16, 7 }
 0x17c   :  { %v444_v35 = vsel %vm228_vm12, %v442_v58, %v443_v28  ;;  %v454_v41 = vsel %vm239_vm13, %v452_v23, %v453_v33  ;;  %v587_v58 = vunpack.c.0.s8 %v586_v14 }
 0x17d   :  { %v426_v29 = vadd.f32 %v424_v27, %v416_v26  ;;  %v472_v30 = vpop.permute.xlu1 %471  ;;  %v462_v31 = vpop.permute.xlu0 %461 }
 0x17e   :  { %v463_v36 = vrot.slane %v462_v31, 2  ;;  %v473_v42 = vrot.slane %v472_v30, 2 }
 0x17f   :  { %v436_v34 = vadd.f32 %v434_v32, %v426_v29  ;;  %v590_v29 = vsub.s32 %v587_v58, %v589_v24 }
 0x180   :  { %v464_v43 = vsel %vm250_vm14, %v462_v31, %v463_v36  ;;  %v474_v48 = vsel %vm261_vm15, %v472_v30, %v473_v42  ;;  %v603_v36 = vstv %s602_s26  ;;  %v606_v42 = vstv %s1148_s29 }
 0x181   :  { %v446_v38 = vadd.f32 %v444_v35, %v436_v34  ;;  %v498_v39 = vpop.permute.xlu1 %497  ;;  %v488_v40 = vpop.permute.xlu0 %487 }
 0x182   :  { %v489_v49 = vrot.slane %v488_v40, 2  ;;  %v499_v52 = vrot.slane %v498_v39, 2 }
 0x183   :  { %v456_v37 = vadd.f32 %v454_v41, %v446_v38  ;;  %v610_v38 = vstv %s748_s30  ;;  %v631_v41 = vstv %s754_s13 }
 0x184   :  { %v490_v55 = vsel %vm162_vm6, %v488_v40, %v489_v49  ;;  %v500_v59 = vsel %vm173_vm7, %v498_v39, %v499_v52  ;;  %v617_v39 = vstv %s750_s0  ;;  %v624_v40 = vstv %s752_s3 }
 0x185   :  { %v466_v45 = vadd.f32 %v464_v43, %v456_v37  ;;  %v518_v46 = vpop.permute.xlu1 %517  ;;  %v508_v47 = vpop.permute.xlu0 %507  ;;  %v613_v37 = vstv %s1150_s12  ;;  %v620_v43 = vstv %s1152_s14 }
 0x186   :  { %v509_v56 = vrot.slane %v508_v47, 2  ;;  %v519_v60 = vrot.slane %v518_v46, 2 }
 0x187   :  { %v476_v50 = vadd.f32 %v474_v48, %v466_v45 }
 0x188   :  { %v510_v63 = vsel %vm184_vm8, %v508_v47, %v509_v56  ;;  %v520_v15 = vsel %vm195_vm9, %v518_v46, %v519_v60 }
 0x189   :  { %v482_v20 = vadd.f32 %v481_v51, %v476_v50  ;;  %v538_v53 = vpop.permute.xlu1 %537  ;;  %v528_v54 = vpop.permute.xlu0 %527  ;;  %v634_v51 = vstv %s1156_s16 }
 0x18a   :  { %v529_v0 = vrot.slane %v528_v54, 2  ;;  %v539_v3 = vrot.slane %v538_v53, 2 }
 0x18b   :  { %v492_v57 = vadd.f32 %v490_v55, %v482_v20  ;;  %v666_v55 = vstv %s1160_s20 }
 0x18c   :  { %v530_v5 = vsel %vm206_vm10, %v528_v54, %v529_v0  ;;  %v540_v9 = vsel %vm217_vm11, %v538_v53, %v539_v3  ;;  %v641_v54 = vstv %s1158_s17  ;;  %v649_v3 = vstv %s1174_s28 }
 0x18d   :  { %v502_v61 = vadd.f32 %v500_v59, %v492_v57  ;;  %v548_v62 = vpop.permute.xlu0 %547  ;;  %v558_v2 = vpop.permute.xlu1 %557  ;;  %v638_v57 = vstv %s1162_s21 }
 0x18e   :  { %v549_v6 = vrot.slane %v548_v62, 2  ;;  %v559_v10 = vrot.slane %v558_v2, 2 }
 0x18f   :  { %v512_v1 = vadd.f32 %v510_v63, %v502_v61  ;;  %v645_v61 = vstv %s1164_s23  ;;  %v670_v63 = vstv %s1168_s27 }
 0x190   :  { %v550_v17 = vsel %vm228_vm12, %v548_v62, %v549_v6  ;;  %v560_v21 = vsel %vm239_vm13, %v558_v2, %v559_v10  ;;  %v663_v62 = vstv %s1166_s24 }
 0x191   :  { %v522_v4 = vadd.f32 %v520_v15, %v512_v1  ;;  %v568_v8 = vpop.permute.xlu0 %567  ;;  %v578_v12 = vpop.permute.xlu1 %577 }
 0x192   :  { %v569_v18 = vrot.slane %v568_v8, 2  ;;  %v579_v22 = vrot.slane %v578_v12, 2 }
 0x193   :  { %v532_v7 = vadd.f32 %v530_v5, %v522_v4  ;;  %v674_v4 = vstv %s1176_s8 }
 0x194   :  { %v570_v25 = vsel %vm250_vm14, %v568_v8, %v569_v18  ;;  %v580_v27 = vsel %vm261_vm15, %v578_v12, %v579_v22  ;;  %v678_v12 = vstv %s1180_s5  ;;  %v657_v18 = vstv %s1185_s4 }
 0x195   :  { %v542_v11 = vadd.f32 %v540_v9, %v532_v7 }
 0x197   :  { %v552_v19 = vadd.f32 %v550_v17, %v542_v11  ;;  %v653_v11 = vstv %s1178_s9 }
 0x199   :  { %v562_v23 = vadd.f32 %v560_v21, %v552_v19  ;;  %v682_v19 = vstv %s1187_s6 }
 0x19b   :  { %v572_v26 = vadd.f32 %v570_v25, %v562_v23 }
 0x19d   :  { %v582_v28 = vadd.f32 %v580_v27, %v572_v26 }
 0x19f   :  { %v583_v30 = vmax.f32 %v582_v28, 0.0 }
 0x1a1   :  { %v591_v31 = vrot.slane %v583_v30, %v590_v29 }
 0x1a3   :  { %v592_v32 = vcombine.high %v591_v31, %v591_v31  ;;  %v596_v33 = vsel %vm595_vm0, %v591_v31, -inf }
 0x1a5   :  { %v598_v34 = vsel %vm597_vm1, %v592_v32, -inf }
 0x1a6   :  { %v599_v35 = vmax.f32 %v596_v33, %v598_v34 }
 0x1a8   :  { %600 = vmax.xlane.f32.xlu0 %v599_v35 }
 0x235   :  { %v601_v45 = vpop.xlane.xlu0 %600 }
 0x236   :  { %v604_v46 = vmul.f32 %v603_v36, %v601_v45  ;;  %v611_v47 = vmul.f32 %v610_v38, %v601_v45  ;;  %v618_v48 = vmul.f32 %v617_v39, %v601_v45  ;;  %v625_v49 = vmul.f32 %v624_v40, %v601_v45 }
 0x237   :  { %v632_v50 = vmul.f32 %v631_v41, %v601_v45 }
 0x238   :  { %v607_v52 = vadd.f32 %v606_v42, %v604_v46  ;;  %v614_v20 = vadd.f32 %v613_v37, %v611_v47  ;;  %v621_v53 = vadd.f32 %v620_v43, %v618_v48  ;;  %v628_v56 = vadd.f32 %v627_v44, %v625_v49 }
 0x239   :  { %v635_v0 = vadd.f32 %v634_v51, %v632_v50 }
 0x23a   :  { %v608_v59 = vmax.f32 %v607_v52, 0.0  ;;  %v615_v60 = vmax.f32 %v614_v20, 0.0  ;;  %v622_v1 = vmax.f32 %v621_v53, 0.0  ;;  %v629_v5 = vmax.f32 %v628_v56, 0.0 }
 0x23b   :  { %v636_v10 = vmax.f32 %v635_v0, 0.0 }
 0x23c   :  { %v642_v2 = vmul.f32 %v641_v54, %v608_v59  ;;  %v667_v15 = vmul.f32 %v666_v55, %v608_v59  ;;  %v646_v7 = vmul.f32 %v645_v61, %v615_v60  ;;  %v671_v9 = vmul.f32 %v670_v63, %v615_v60 }
 0x23d   :  { %v650_v13 = vmul.f32 %v649_v3, %v622_v1  ;;  %v675_v14 = vmul.f32 %v674_v4, %v622_v1  ;;  %v654_v22 = vmul.f32 %v653_v11, %v629_v5  ;;  %v679_v58 = vmul.f32 %v678_v12, %v629_v5 }
 0x23e   :  { %v643_v6 = vadd.f32 %v642_v2, %v638_v57  ;;  %v668_v8 = vadd.f32 %v667_v15, %v663_v62  ;;  %v658_v25 = vmul.f32 %v657_v18, %v636_v10  ;;  %v683_v27 = vmul.f32 %v682_v19, %v636_v10 }
 0x240   :  { %v647_v16 = vadd.f32 %v646_v7, %v643_v6  ;;  %v672_v17 = vadd.f32 %v671_v9, %v668_v8 }
 0x242   :  { %v651_v21 = vadd.f32 %v650_v13, %v647_v16  ;;  %v676_v23 = vadd.f32 %v675_v14, %v672_v17 }
 0x244   :  { %v655_v24 = vadd.f32 %v654_v22, %v651_v21  ;;  %v680_v26 = vadd.f32 %v679_v58, %v676_v23 }
 0x246   :  { %v659_v28 = vadd.f32 %v658_v25, %v655_v24  ;;  %v684_v29 = vadd.f32 %v683_v27, %v680_v26 }
 0x248   :  { %661 = vst.msk [vmem:[#allocation15] sm:$0x3] %vm660_vm2, %v659_v28 }
 0x249   :  { %686 = vst.msk [vmem:[#allocation15] sm:$0x3] %vm685_vm3, %v684_v29 }
 0x24a   :  { %881 = shalt.err (!%p878_p9)
}
 0x24b   :  { %s882_s2 = scalar_lea.hbm %s1218_s7, 32 }
 0x24c   :  { %p883_p10 = scmp.ne.s32.totalorder %s1218_s7, %s882_s2  ;;  %p886_p11 = scmp.lt.u32.totalorder %s882_s2, %s1218_s7 }
 0x24e   :  { %p888_p12 = pnand %p886_p11, %p883_p10 }
 0x250   :  { %891 = shalt.err (!%p888_p12)
}
 0x251   :  { %696 = dma.vmem_to_hbm [thread:$0]  %s694_s11, 32, %s1218_s7, [#allocation6]  }
 0x252   :  { %900 = dma.done.wait [#allocation6], 32  }
 0x253   :  { %901 = vsyncadd [#allocation6], 4294967264 }
 0x254   :  { %700 = vsyncpa [#allocation5], 1 }
 0x255   :  { %701 = vsyncpa [#allocation6], 1 }
 0x256   :  { %702 = vsyncpa [#allocation7], 1 }
 0x257   :  { %703 = vsyncpa [#allocation10], 1 }
 0x258   :  { %704 = vsyncpa [#allocation13], 1 }

</bundles_post_ra>
